<compile_context>
chip_gen: v7x
topology: tpu7x:2x2x1
jax: 0.10.0
libtpu: 0.0.40
codegen_flags: <defaults>
</compile_context>

<pallas_src>
import math
from functools import partial

import jax
import jax.numpy as jnp
import numpy as np
from jax import lax
from jax.experimental import pallas as pl
from jax.experimental.pallas import tpu as pltpu


# --------------------------- Pallas kernel body -----------------------------

def hyena_operator_kernel(u_ref, w_in_ref, b_in_ref, sw_ref, sb_ref, k_ref,
                          dbias_ref, w_out_ref, b_out_ref, o_ref,
                          *, L, C, mxu_dtype):
    """in_proj -> causal depthwise short conv -> gate -> causal long conv
    (+ D bias) -> gate -> out_proj, all in a lane-dense (L, C) layout where
    C = block_b * d_model fills the 128-wide lane dimension."""
    u = u_ref[0]                                   # (L, C), lane = b_local*D + d

    # ---- in_proj: (L, C) @ block-diagonal (C, 3C) on the MXU ----------------
    # Block-diagonal weights (built host-side, pre-cast) give K = C instead of
    # K = D and keep one consistent lane-dense layout end-to-end.  Output
    # channel order is [proj_part, batch, d] so x1/x2/v are aligned slices.
    proj = jnp.dot(u.astype(mxu_dtype), w_in_ref[...],
                   preferred_element_type=jnp.float32) + b_in_ref[...]  # (L, 3C)

    # Causal index along time (the sublane axis).  Batch lives in the lanes,
    # so sublane rolls never mix batch elements; only wrapped rows need a mask.
    t_idx = lax.broadcasted_iota(jnp.int32, (L, 1), 0)

    # ---- depthwise short filter: Conv1d(3D, 3D, k=3, pad=2, groups=3D)[:L] --
    p1 = jnp.where(t_idx >= 1, pltpu.roll(proj, 1, axis=0), 0.0)   # proj[t-1]
    p2 = jnp.where(t_idx >= 2, pltpu.roll(proj, 2, axis=0), 0.0)   # proj[t-2]
    uc = (sw_ref[0:1, :] * p2 + sw_ref[1:2, :] * p1
          + sw_ref[2:3, :] * proj + sb_ref[...])                   # (L, 3C)

    x1 = uc[:, 0:C]                 # 128-lane-aligned part slices
    x2 = uc[:, C:2 * C]
    v = uc[:, 2 * C:3 * C]
    v = v * x2                      # gate (dropout p=0 -> identity)

    # ---- long causal conv with the implicit filter k (L, C) -----------------
    # y[t] = sum_{tau<=t} v[t-tau] * k[tau]  (== zero-padded torch fftconv
    # truncated to L).  Incremental shift-by-1 carry in the lane-dense layout:
    # acc / v_sh are only ceil(L/8) vregs each, so no spills.
    not_first = t_idx >= 1
    acc = v * k_ref[0:1, :]
    v_sh = v
    if L <= 64:
        # Fully unrolled: static k-row reads; rolls (XLU) and selects/FMAs
        # (VALU) are all visible to the LLO scheduler for co-issue.
        for tau in range(1, L):
            v_sh = jnp.where(not_first, pltpu.roll(v_sh, 1, axis=0), 0.0)
            acc = acc + v_sh * k_ref[tau:tau + 1, :]
    else:
        # TODO(synk): for production L tile the lag/time dimension onto a grid
        # "arbitrary" axis (pl.when-initialized VMEM accumulator) or use
        # chunked Toeplitz MXU matmuls; this serial O(L) loop is the
        # asymptotic limiter and keeps the whole (L, 3C) slab VMEM-resident.
        def lag_body(tau, carry):
            a, s = carry
            s = jnp.where(not_first, pltpu.roll(s, 1, axis=0), 0.0)
            a = a + s * k_ref[pl.ds(tau, 1), :]
            return a, s
        acc, v_sh = lax.fori_loop(1, L, lag_body, (acc, v_sh), unroll=8)

    v = acc + v * dbias_ref[...]
    v = v * x1                      # output gate

    # ---- out_proj: (L, C) @ block-diagonal (C, C) on the MXU ----------------
    out = jnp.dot(v.astype(mxu_dtype), w_out_ref[...],
                  preferred_element_type=jnp.float32) + b_out_ref[...]

    # Lane-dense direct store: the output block IS the (L, C) slab.
    o_ref[0] = out.astype(o_ref.dtype)


# ------------------------------ host wrappers --------------------------------

def _block_diag(w, nb):
    """(Di, Do) -> (nb*Di, nb*Do) block-diagonal replication (host-side)."""
    di, do = w.shape
    return jnp.einsum("bc,ij->bicj", jnp.eye(nb, dtype=w.dtype),
                      w).reshape(nb * di, nb * do)


def positional_embedding_forward(p, L):
    """PositionalEmbedding.forward(L): returns (z[:L], t[:L])."""
    return p["z"][:L], p["t_pos"][:L]


def hyena_filter(p, L):
    """HyenaFilter.filter(L): Sin-MLP over the PositionalEmbedding + exp
    modulation -> implicit filter k of shape (L, D).

    Computed in plain JAX: it is a tiny (L, D) tensor built from (OF, OF)
    matmuls; a dedicated pallas_call (extra launch + masked-store HBM round
    trip) would cost more than the compute it contains.
    """
    z, t_pos = positional_embedding_forward(p, L)
    freq = p["freq"]
    h = jnp.sin(freq * (z @ p["fw1"] + p["fb1"]))
    h = jnp.sin(freq * (h @ p["fw2"] + p["fb2"]))
    h = jnp.sin(freq * (h @ p["fw3"] + p["fb3"]))
    h = h @ p["fwo"]
    return h * (jnp.exp(-t_pos * jnp.abs(p["deltas"])) + p["shift"])    # (L, D)


def _pick_block_b(B, D):
    """Largest batch block with block_b*D <= 128 (no masked partial stores),
    preferring >= 4 grid steps so double-buffering pipelines and both v7x
    TensorCores get multiple steps."""
    lane_cap = max(1, 128 // D) if D <= 128 else 1
    divs = [b for b in range(1, B + 1) if B % b == 0 and b <= lane_cap]
    piped = [b for b in divs if B // b >= 4]
    return max(piped) if piped else max(divs)


def hyena_operator(u, params, *, block_b=None, mxu_dtype=jnp.float32):
    """Fused Hyena operator forward.  Pass mxu_dtype=jnp.bfloat16 on v6e/v7x
    for production d_model (weights are pre-cast host-side, halving weight DMA);
    at tiny d_model keep f32 — the matmuls are not the bottleneck."""
    B, L, D = u.shape
    if block_b is None:
        block_b = _pick_block_b(B, D)
    assert B % block_b == 0
    nblk = B // block_b
    C = block_b * D

    k = hyena_filter(params, L)                                   # (L, D)

    # ---- host-side relayout into the lane-dense (L, C) world ----------------
    # Lane index = b_local*D + d.  Weights become block-diagonal with output
    # channel order [proj_part, batch, d] so x1/x2/v are 128-aligned slices.
    u_ld = u.reshape(nblk, block_b, L, D).transpose(0, 2, 1, 3).reshape(nblk, L, C)

    w_in_3 = params["w_in"].reshape(D, 3, D)
    w_in_bd = jnp.concatenate(
        [_block_diag(w_in_3[:, part, :], block_b) for part in range(3)], axis=1)
    w_out_bd = _block_diag(params["w_out"], block_b)              # (C, C)

    def tile_parts(x):   # (rows, 3D) -> (rows, 3C), part-major then batch
        r = x.shape[0]
        return jnp.tile(x.reshape(r, 3, 1, D), (1, 1, block_b, 1)).reshape(r, 3 * C)

    b_in_ld = tile_parts(params["b_in"])                          # (1, 3C)
    sw_ld = tile_parts(params["short_w"])                         # (3, 3C)
    sb_ld = tile_parts(params["short_b"])                         # (1, 3C)
    k_ld = jnp.tile(k, (1, block_b))                              # (L, C)
    dbias_ld = jnp.tile(params["d_bias"], (1, block_b))           # (1, C)
    b_out_ld = jnp.tile(params["b_out"], (1, block_b))            # (1, C)

    # Pre-cast grid-invariant matmul operands host-side (no per-step casts,
    # halves weight DMA when bf16 is requested on v6e/v7x).
    w_in_bd = w_in_bd.astype(mxu_dtype)
    w_out_bd = w_out_bd.astype(mxu_dtype)

    out_ld = pl.pallas_call(
        partial(hyena_operator_kernel, L=L, C=C, mxu_dtype=mxu_dtype),
        out_shape=jax.ShapeDtypeStruct((nblk, L, C), jnp.float32),
        grid=(nblk,),
        in_specs=[
            pl.BlockSpec((1, L, C), lambda i: (i, 0, 0)),         # u block (lane-dense)
            pl.BlockSpec((C, 3 * C), lambda i: (0, 0)),           # W_in (block-diag)
            pl.BlockSpec((1, 3 * C), lambda i: (0, 0)),           # b_in
            pl.BlockSpec((3, 3 * C), lambda i: (0, 0)),           # short conv w
            pl.BlockSpec((1, 3 * C), lambda i: (0, 0)),           # short conv b
            pl.BlockSpec((L, C), lambda i: (0, 0)),               # k (implicit filter)
            pl.BlockSpec((1, C), lambda i: (0, 0)),               # D bias
            pl.BlockSpec((C, C), lambda i: (0, 0)),               # W_out (block-diag)
            pl.BlockSpec((1, C), lambda i: (0, 0)),               # b_out
        ],
        out_specs=pl.BlockSpec((1, L, C), lambda i: (i, 0, 0)),
        compiler_params=pltpu.CompilerParams(
            dimension_semantics=("parallel",),
            # Explicit scoped-VMEM budget (safe on v7x's 64 MiB physical VMEM);
            # at these shapes the live set is only a few hundred KiB.
            # TODO(synk): at production L retile L onto the grid and re-budget.
            vmem_limit_bytes=32 * 1024 * 1024),
    )(u_ld, w_in_bd, b_in_ld, sw_ld, sb_ld, k_ld, dbias_ld, w_out_bd, b_out_ld)

    # Un-interleave (nblk, L, block_b*D) -> (B, L, D).  When D is a multiple of
    # 128, block_b == 1 and this collapses to a plain reshape (no transpose).
    out = out_ld.reshape(nblk, L, block_b, D).transpose(0, 2, 1, 3)
    return out.reshape(B, L, D)


# -------------------------- pure-JAX reference -------------------------------

def reference_forward(u, p):
    """Mirrors HyenaOperator.forward (order=2), incl. the torch fftconv math."""
    B, L, D = u.shape
    z, t_pos, freq = p["z"][:L], p["t_pos"][:L], p["freq"]
    h = jnp.sin(freq * (z @ p["fw1"] + p["fb1"]))
    h = jnp.sin(freq * (h @ p["fw2"] + p["fb2"]))
    h = jnp.sin(freq * (h @ p["fw3"] + p["fb3"]))
    h = h @ p["fwo"]
    k = h * (jnp.exp(-t_pos * jnp.abs(p["deltas"])) + p["shift"])     # (L, D)

    proj = u @ p["w_in"] + p["b_in"]
    pad = jnp.pad(proj, ((0, 0), (2, 0), (0, 0)))
    sw = p["short_w"]
    uc = (sw[0] * pad[:, :L] + sw[1] * pad[:, 1:L + 1]
          + sw[2] * pad[:, 2:L + 2] + p["short_b"])
    x1, x2, v = uc[..., :D], uc[..., D:2 * D], uc[..., 2 * D:]
    v = v * x2
    fft_size = 2 * L
    k_f = jnp.fft.rfft(k, n=fft_size, axis=0) / fft_size
    v_f = jnp.fft.rfft(v, n=fft_size, axis=1)
    y = jnp.fft.irfft(v_f * k_f[None], n=fft_size, axis=1, norm="forward")[:, :L]
    v = y + v * p["d_bias"]
    v = v * x1
    return v @ p["w_out"] + p["b_out"]


# ------------------------------- parameters ----------------------------------

def make_params(key, d_model, l_max, filter_order=16, emb_dim=3):
    ks = jax.random.split(key, 16)

    def dense(k, fan_in, shape):
        return jax.random.normal(k, shape, jnp.float32) / np.sqrt(fan_in)

    D, OF = d_model, filter_order
    p = {
        "w_in": dense(ks[0], D, (D, 3 * D)),
        "b_in": dense(ks[1], D, (1, 3 * D)),
        "w_out": dense(ks[2], D, (D, D)),
        "b_out": dense(ks[3], D, (1, D)),
        "short_w": dense(ks[4], 3, (3, 3 * D)),      # (lag, channel), lag 0 == t-2
        "short_b": dense(ks[5], 3, (1, 3 * D)),
        "fw1": dense(ks[6], emb_dim, (emb_dim, OF)),
        "fb1": dense(ks[7], emb_dim, (1, OF)),
        "fw2": dense(ks[8], OF, (OF, OF)),
        "fb2": dense(ks[9], OF, (1, OF)),
        "fw3": dense(ks[10], OF, (OF, OF)),
        "fb3": dense(ks[11], OF, (1, OF)),
        "fwo": dense(ks[12], OF, (OF, D)),
        "d_bias": jax.random.normal(ks[13], (1, D), jnp.float32),
        "freq": jnp.ones((1, OF), jnp.float32),      # Sin(w=1), shared act module
        "shift": 0.05,
    }
    # PositionalEmbedding constants (z = [t, Re exp(-i f w), Im exp(-i f w)])
    bands = (emb_dim - 1) // 2
    t01 = jnp.linspace(0.0, 1.0, l_max)[:, None]                    # (L, 1)
    t_rescaled = jnp.linspace(0.0, float(l_max - 1), l_max)[:, None]
    w = 2.0 * math.pi * t_rescaled / l_max
    f = jnp.linspace(1e-4, float(bands - 1), bands)[None, :]
    theta = w * f                                                   # (L, bands)
    p["z"] = jnp.concatenate([t01, jnp.cos(theta), -jnp.sin(theta)], axis=-1)
    p["t_pos"] = t01
    # ExponentialModulation deltas
    target, fast, slow = 0.01, 0.3, 1.5
    max_decay = math.log(target) / fast
    min_decay = math.log(target) / slow
    p["deltas"] = jnp.linspace(min_decay, max_decay, D)[None, :]
    return p


# ---------------------------------- main --------------------------------------

if __name__ == "__main__":
    # block_b*D == 128 -> fully lane-dense slabs and unmasked stores;
    # nblk == 4 grid steps -> BlockSpec double-buffering can pipeline and both
    # v7x TensorCores get >= 2 steps each.
    B, L, D = 64, 16, 8          # batch, seq_len (= l_max), d_model
    FILTER_ORDER, EMB_DIM = 16, 3

    key = jax.random.PRNGKey(0)
    pkey, ukey = jax.random.split(key)
    params = make_params(pkey, d_model=D, l_max=L,
                         filter_order=FILTER_ORDER, emb_dim=EMB_DIM)
    u = jax.random.normal(ukey, (B, L, D), jnp.float32)

    out = jax.block_until_ready(hyena_operator(u, params))
    ref = jax.block_until_ready(reference_forward(u, params))

    assert out.shape == (B, L, D) and out.dtype == jnp.float32
    np.testing.assert_allclose(np.asarray(out), np.asarray(ref),
                               rtol=1e-2, atol=1e-2)
    print("KERNEL_OK")
</pallas_src>

<mosaic_0001>
module attributes {stable_mosaic.version = 11 : i64} {
  func.func @hyena_operator_kernel(%arg0: i32, %arg1: memref<1x16x128xf32, #tpu.memory_space<vmem>>, %arg2: memref<128x384xf32, #tpu.memory_space<vmem>>, %arg3: memref<1x384xf32, #tpu.memory_space<vmem>>, %arg4: memref<3x384xf32, #tpu.memory_space<vmem>>, %arg5: memref<1x384xf32, #tpu.memory_space<vmem>>, %arg6: memref<16x128xf32, #tpu.memory_space<vmem>>, %arg7: memref<1x128xf32, #tpu.memory_space<vmem>>, %arg8: memref<128x128xf32, #tpu.memory_space<vmem>>, %arg9: memref<1x128xf32, #tpu.memory_space<vmem>>, %arg10: memref<1x16x128xf32, #tpu.memory_space<vmem>>) attributes {dimension_semantics = [#tpu.dimension_semantics<parallel>], iteration_bounds = array<i64: 4>, scalar_prefetch = 0 : i64, scratch_operands = 0 : i64, tpu.core_type = #tpu.core_type<tc>, window_params = [{transform_indices = @transform_0, window_bounds = array<i64: 1, 16, 128>}, {pipeline_mode = #tpu.pipeline_mode<synchronous>, transform_indices = @transform_1, window_bounds = array<i64: 128, 384>}, {pipeline_mode = #tpu.pipeline_mode<synchronous>, transform_indices = @transform_2, window_bounds = array<i64: 1, 384>}, {pipeline_mode = #tpu.pipeline_mode<synchronous>, transform_indices = @transform_3, window_bounds = array<i64: 3, 384>}, {pipeline_mode = #tpu.pipeline_mode<synchronous>, transform_indices = @transform_4, window_bounds = array<i64: 1, 384>}, {pipeline_mode = #tpu.pipeline_mode<synchronous>, transform_indices = @transform_5, window_bounds = array<i64: 16, 128>}, {pipeline_mode = #tpu.pipeline_mode<synchronous>, transform_indices = @transform_6, window_bounds = array<i64: 1, 128>}, {pipeline_mode = #tpu.pipeline_mode<synchronous>, transform_indices = @transform_7, window_bounds = array<i64: 128, 128>}, {pipeline_mode = #tpu.pipeline_mode<synchronous>, transform_indices = @transform_8, window_bounds = array<i64: 1, 128>}, {transform_indices = @transform_9, window_bounds = array<i64: 1, 16, 128>}]} {
    %c0 = arith.constant 0 : index
    %c0_0 = arith.constant 0 : index
    %c0_1 = arith.constant 0 : index
    %0 = vector.load %arg1[%c0, %c0_0, %c0_1] : memref<1x16x128xf32, #tpu.memory_space<vmem>>, vector<1x16x128xf32>
    %1 = vector.shape_cast %0 : vector<1x16x128xf32> to vector<16x128xf32>
    %c0_2 = arith.constant 0 : index
    %c0_3 = arith.constant 0 : index
    %2 = vector.load %arg2[%c0_2, %c0_3] : memref<128x384xf32, #tpu.memory_space<vmem>>, vector<128x384xf32>
    %cst = arith.constant dense<0.000000e+00> : vector<16x384xf32>
    %3 = tpu.matmul %1, %2, %cst {dimension_numbers = #tpu.dot_dimension_numbers<[1], [0], [0], [1], [0, 0, 1, 1], [], []>} : vector<16x128xf32>, vector<128x384xf32>, vector<16x384xf32> -> vector<16x384xf32>
    %c0_4 = arith.constant 0 : index
    %c0_5 = arith.constant 0 : index
    %4 = vector.load %arg3[%c0_4, %c0_5] : memref<1x384xf32, #tpu.memory_space<vmem>>, vector<1x384xf32>
    %5 = vector.broadcast %4 : vector<1x384xf32> to vector<16x384xf32>
    %6 = arith.addf %3, %5 : vector<16x384xf32>
    %7 = tpu.iota {dimensions = array<i32: 0>} : vector<16x1xi32>
    %c1_i32 = arith.constant 1 : i32
    %8 = vector.broadcast %c1_i32 : i32 to vector<16x1xi32>
    %9 = arith.cmpi sge, %7, %8 : vector<16x1xi32>
    %c1_i32_6 = arith.constant 1 : i32
    %10 = tpu.dynamic_rotate %6 by %c1_i32_6 dim 0 : vector<16x384xf32>, i32 -> vector<16x384xf32>
    %cst_7 = arith.constant 0.000000e+00 : f32
    %11 = vector.shape_cast %9 : vector<16x1xi1> to vector<16x1xi1>
    %12 = vector.broadcast %11 : vector<16x1xi1> to vector<16x384xi1>
    %13 = vector.broadcast %cst_7 : f32 to vector<16x384xf32>
    %14 = arith.select %12, %10, %13 : vector<16x384xi1>, vector<16x384xf32>
    %c2_i32 = arith.constant 2 : i32
    %15 = vector.broadcast %c2_i32 : i32 to vector<16x1xi32>
    %16 = arith.cmpi sge, %7, %15 : vector<16x1xi32>
    %c2_i32_8 = arith.constant 2 : i32
    %17 = tpu.dynamic_rotate %6 by %c2_i32_8 dim 0 : vector<16x384xf32>, i32 -> vector<16x384xf32>
    %cst_9 = arith.constant 0.000000e+00 : f32
    %18 = vector.shape_cast %16 : vector<16x1xi1> to vector<16x1xi1>
    %19 = vector.broadcast %18 : vector<16x1xi1> to vector<16x384xi1>
    %20 = vector.broadcast %cst_9 : f32 to vector<16x384xf32>
    %21 = arith.select %19, %17, %20 : vector<16x384xi1>, vector<16x384xf32>
    %c0_10 = arith.constant 0 : index
    %c0_11 = arith.constant 0 : index
    %22 = vector.load %arg4[%c0_10, %c0_11] : memref<3x384xf32, #tpu.memory_space<vmem>>, vector<1x384xf32>
    %23 = vector.broadcast %22 : vector<1x384xf32> to vector<16x384xf32>
    %24 = arith.mulf %23, %21 : vector<16x384xf32>
    %c1 = arith.constant 1 : index
    %c0_12 = arith.constant 0 : index
    %25 = vector.load %arg4[%c1, %c0_12] : memref<3x384xf32, #tpu.memory_space<vmem>>, vector<1x384xf32>
    %26 = vector.broadcast %25 : vector<1x384xf32> to vector<16x384xf32>
    %27 = arith.mulf %26, %14 : vector<16x384xf32>
    %28 = arith.addf %24, %27 : vector<16x384xf32>
    %c2 = arith.constant 2 : index
    %c0_13 = arith.constant 0 : index
    %29 = vector.load %arg4[%c2, %c0_13] : memref<3x384xf32, #tpu.memory_space<vmem>>, vector<1x384xf32>
    %30 = vector.broadcast %29 : vector<1x384xf32> to vector<16x384xf32>
    %31 = arith.mulf %30, %6 : vector<16x384xf32>
    %32 = arith.addf %28, %31 : vector<16x384xf32>
    %c0_14 = arith.constant 0 : index
    %c0_15 = arith.constant 0 : index
    %33 = vector.load %arg5[%c0_14, %c0_15] : memref<1x384xf32, #tpu.memory_space<vmem>>, vector<1x384xf32>
    %34 = vector.broadcast %33 : vector<1x384xf32> to vector<16x384xf32>
    %35 = arith.addf %32, %34 : vector<16x384xf32>
    %36 = vector.extract_strided_slice %35 {offsets = [0, 0], sizes = [16, 128], strides = [1, 1]} : vector<16x384xf32> to vector<16x128xf32>
    %37 = vector.extract_strided_slice %35 {offsets = [0, 128], sizes = [16, 128], strides = [1, 1]} : vector<16x384xf32> to vector<16x128xf32>
    %38 = vector.extract_strided_slice %35 {offsets = [0, 256], sizes = [16, 128], strides = [1, 1]} : vector<16x384xf32> to vector<16x128xf32>
    %39 = arith.mulf %38, %37 : vector<16x128xf32>
    %c1_i32_16 = arith.constant 1 : i32
    %40 = vector.broadcast %c1_i32_16 : i32 to vector<16x1xi32>
    %41 = arith.cmpi sge, %7, %40 : vector<16x1xi32>
    %c0_17 = arith.constant 0 : index
    %c0_18 = arith.constant 0 : index
    %42 = vector.load %arg6[%c0_17, %c0_18] : memref<16x128xf32, #tpu.memory_space<vmem>>, vector<1x128xf32>
    %43 = vector.broadcast %42 : vector<1x128xf32> to vector<16x128xf32>
    %44 = arith.mulf %39, %43 : vector<16x128xf32>
    %c1_i32_19 = arith.constant 1 : i32
    %45 = tpu.dynamic_rotate %39 by %c1_i32_19 dim 0 : vector<16x128xf32>, i32 -> vector<16x128xf32>
    %cst_20 = arith.constant 0.000000e+00 : f32
    %46 = vector.shape_cast %41 : vector<16x1xi1> to vector<16x1xi1>
    %47 = vector.broadcast %46 : vector<16x1xi1> to vector<16x128xi1>
    %48 = vector.broadcast %cst_20 : f32 to vector<16x128xf32>
    %49 = arith.select %47, %45, %48 : vector<16x128xi1>, vector<16x128xf32>
    %c1_21 = arith.constant 1 : index
    %c0_22 = arith.constant 0 : index
    %50 = vector.load %arg6[%c1_21, %c0_22] : memref<16x128xf32, #tpu.memory_space<vmem>>, vector<1x128xf32>
    %51 = vector.broadcast %50 : vector<1x128xf32> to vector<16x128xf32>
    %52 = arith.mulf %49, %51 : vector<16x128xf32>
    %53 = arith.addf %44, %52 : vector<16x128xf32>
    %c1_i32_23 = arith.constant 1 : i32
    %54 = tpu.dynamic_rotate %49 by %c1_i32_23 dim 0 : vector<16x128xf32>, i32 -> vector<16x128xf32>
    %cst_24 = arith.constant 0.000000e+00 : f32
    %55 = vector.shape_cast %41 : vector<16x1xi1> to vector<16x1xi1>
    %56 = vector.broadcast %55 : vector<16x1xi1> to vector<16x128xi1>
    %57 = vector.broadcast %cst_24 : f32 to vector<16x128xf32>
    %58 = arith.select %56, %54, %57 : vector<16x128xi1>, vector<16x128xf32>
    %c2_25 = arith.constant 2 : index
    %c0_26 = arith.constant 0 : index
    %59 = vector.load %arg6[%c2_25, %c0_26] : memref<16x128xf32, #tpu.memory_space<vmem>>, vector<1x128xf32>
    %60 = vector.broadcast %59 : vector<1x128xf32> to vector<16x128xf32>
    %61 = arith.mulf %58, %60 : vector<16x128xf32>
    %62 = arith.addf %53, %61 : vector<16x128xf32>
    %c1_i32_27 = arith.constant 1 : i32
    %63 = tpu.dynamic_rotate %58 by %c1_i32_27 dim 0 : vector<16x128xf32>, i32 -> vector<16x128xf32>
    %cst_28 = arith.constant 0.000000e+00 : f32
    %64 = vector.shape_cast %41 : vector<16x1xi1> to vector<16x1xi1>
    %65 = vector.broadcast %64 : vector<16x1xi1> to vector<16x128xi1>
    %66 = vector.broadcast %cst_28 : f32 to vector<16x128xf32>
    %67 = arith.select %65, %63, %66 : vector<16x128xi1>, vector<16x128xf32>
    %c3 = arith.constant 3 : index
    %c0_29 = arith.constant 0 : index
    %68 = vector.load %arg6[%c3, %c0_29] : memref<16x128xf32, #tpu.memory_space<vmem>>, vector<1x128xf32>
    %69 = vector.broadcast %68 : vector<1x128xf32> to vector<16x128xf32>
    %70 = arith.mulf %67, %69 : vector<16x128xf32>
    %71 = arith.addf %62, %70 : vector<16x128xf32>
    %c1_i32_30 = arith.constant 1 : i32
    %72 = tpu.dynamic_rotate %67 by %c1_i32_30 dim 0 : vector<16x128xf32>, i32 -> vector<16x128xf32>
    %cst_31 = arith.constant 0.000000e+00 : f32
    %73 = vector.shape_cast %41 : vector<16x1xi1> to vector<16x1xi1>
    %74 = vector.broadcast %73 : vector<16x1xi1> to vector<16x128xi1>
    %75 = vector.broadcast %cst_31 : f32 to vector<16x128xf32>
    %76 = arith.select %74, %72, %75 : vector<16x128xi1>, vector<16x128xf32>
    %c4 = arith.constant 4 : index
    %c0_32 = arith.constant 0 : index
    %77 = vector.load %arg6[%c4, %c0_32] : memref<16x128xf32, #tpu.memory_space<vmem>>, vector<1x128xf32>
    %78 = vector.broadcast %77 : vector<1x128xf32> to vector<16x128xf32>
    %79 = arith.mulf %76, %78 : vector<16x128xf32>
    %80 = arith.addf %71, %79 : vector<16x128xf32>
    %c1_i32_33 = arith.constant 1 : i32
    %81 = tpu.dynamic_rotate %76 by %c1_i32_33 dim 0 : vector<16x128xf32>, i32 -> vector<16x128xf32>
    %cst_34 = arith.constant 0.000000e+00 : f32
    %82 = vector.shape_cast %41 : vector<16x1xi1> to vector<16x1xi1>
    %83 = vector.broadcast %82 : vector<16x1xi1> to vector<16x128xi1>
    %84 = vector.broadcast %cst_34 : f32 to vector<16x128xf32>
    %85 = arith.select %83, %81, %84 : vector<16x128xi1>, vector<16x128xf32>
    %c5 = arith.constant 5 : index
    %c0_35 = arith.constant 0 : index
    %86 = vector.load %arg6[%c5, %c0_35] : memref<16x128xf32, #tpu.memory_space<vmem>>, vector<1x128xf32>
    %87 = vector.broadcast %86 : vector<1x128xf32> to vector<16x128xf32>
    %88 = arith.mulf %85, %87 : vector<16x128xf32>
    %89 = arith.addf %80, %88 : vector<16x128xf32>
    %c1_i32_36 = arith.constant 1 : i32
    %90 = tpu.dynamic_rotate %85 by %c1_i32_36 dim 0 : vector<16x128xf32>, i32 -> vector<16x128xf32>
    %cst_37 = arith.constant 0.000000e+00 : f32
    %91 = vector.shape_cast %41 : vector<16x1xi1> to vector<16x1xi1>
    %92 = vector.broadcast %91 : vector<16x1xi1> to vector<16x128xi1>
    %93 = vector.broadcast %cst_37 : f32 to vector<16x128xf32>
    %94 = arith.select %92, %90, %93 : vector<16x128xi1>, vector<16x128xf32>
    %c6 = arith.constant 6 : index
    %c0_38 = arith.constant 0 : index
    %95 = vector.load %arg6[%c6, %c0_38] : memref<16x128xf32, #tpu.memory_space<vmem>>, vector<1x128xf32>
    %96 = vector.broadcast %95 : vector<1x128xf32> to vector<16x128xf32>
    %97 = arith.mulf %94, %96 : vector<16x128xf32>
    %98 = arith.addf %89, %97 : vector<16x128xf32>
    %c1_i32_39 = arith.constant 1 : i32
    %99 = tpu.dynamic_rotate %94 by %c1_i32_39 dim 0 : vector<16x128xf32>, i32 -> vector<16x128xf32>
    %cst_40 = arith.constant 0.000000e+00 : f32
    %100 = vector.shape_cast %41 : vector<16x1xi1> to vector<16x1xi1>
    %101 = vector.broadcast %100 : vector<16x1xi1> to vector<16x128xi1>
    %102 = vector.broadcast %cst_40 : f32 to vector<16x128xf32>
    %103 = arith.select %101, %99, %102 : vector<16x128xi1>, vector<16x128xf32>
    %c7 = arith.constant 7 : index
    %c0_41 = arith.constant 0 : index
    %104 = vector.load %arg6[%c7, %c0_41] : memref<16x128xf32, #tpu.memory_space<vmem>>, vector<1x128xf32>
    %105 = vector.broadcast %104 : vector<1x128xf32> to vector<16x128xf32>
    %106 = arith.mulf %103, %105 : vector<16x128xf32>
    %107 = arith.addf %98, %106 : vector<16x128xf32>
    %c1_i32_42 = arith.constant 1 : i32
    %108 = tpu.dynamic_rotate %103 by %c1_i32_42 dim 0 : vector<16x128xf32>, i32 -> vector<16x128xf32>
    %cst_43 = arith.constant 0.000000e+00 : f32
    %109 = vector.shape_cast %41 : vector<16x1xi1> to vector<16x1xi1>
    %110 = vector.broadcast %109 : vector<16x1xi1> to vector<16x128xi1>
    %111 = vector.broadcast %cst_43 : f32 to vector<16x128xf32>
    %112 = arith.select %110, %108, %111 : vector<16x128xi1>, vector<16x128xf32>
    %c8 = arith.constant 8 : index
    %c0_44 = arith.constant 0 : index
    %113 = vector.load %arg6[%c8, %c0_44] : memref<16x128xf32, #tpu.memory_space<vmem>>, vector<1x128xf32>
    %114 = vector.broadcast %113 : vector<1x128xf32> to vector<16x128xf32>
    %115 = arith.mulf %112, %114 : vector<16x128xf32>
    %116 = arith.addf %107, %115 : vector<16x128xf32>
    %c1_i32_45 = arith.constant 1 : i32
    %117 = tpu.dynamic_rotate %112 by %c1_i32_45 dim 0 : vector<16x128xf32>, i32 -> vector<16x128xf32>
    %cst_46 = arith.constant 0.000000e+00 : f32
    %118 = vector.shape_cast %41 : vector<16x1xi1> to vector<16x1xi1>
    %119 = vector.broadcast %118 : vector<16x1xi1> to vector<16x128xi1>
    %120 = vector.broadcast %cst_46 : f32 to vector<16x128xf32>
    %121 = arith.select %119, %117, %120 : vector<16x128xi1>, vector<16x128xf32>
    %c9 = arith.constant 9 : index
    %c0_47 = arith.constant 0 : index
    %122 = vector.load %arg6[%c9, %c0_47] : memref<16x128xf32, #tpu.memory_space<vmem>>, vector<1x128xf32>
    %123 = vector.broadcast %122 : vector<1x128xf32> to vector<16x128xf32>
    %124 = arith.mulf %121, %123 : vector<16x128xf32>
    %125 = arith.addf %116, %124 : vector<16x128xf32>
    %c1_i32_48 = arith.constant 1 : i32
    %126 = tpu.dynamic_rotate %121 by %c1_i32_48 dim 0 : vector<16x128xf32>, i32 -> vector<16x128xf32>
    %cst_49 = arith.constant 0.000000e+00 : f32
    %127 = vector.shape_cast %41 : vector<16x1xi1> to vector<16x1xi1>
    %128 = vector.broadcast %127 : vector<16x1xi1> to vector<16x128xi1>
    %129 = vector.broadcast %cst_49 : f32 to vector<16x128xf32>
    %130 = arith.select %128, %126, %129 : vector<16x128xi1>, vector<16x128xf32>
    %c10 = arith.constant 10 : index
    %c0_50 = arith.constant 0 : index
    %131 = vector.load %arg6[%c10, %c0_50] : memref<16x128xf32, #tpu.memory_space<vmem>>, vector<1x128xf32>
    %132 = vector.broadcast %131 : vector<1x128xf32> to vector<16x128xf32>
    %133 = arith.mulf %130, %132 : vector<16x128xf32>
    %134 = arith.addf %125, %133 : vector<16x128xf32>
    %c1_i32_51 = arith.constant 1 : i32
    %135 = tpu.dynamic_rotate %130 by %c1_i32_51 dim 0 : vector<16x128xf32>, i32 -> vector<16x128xf32>
    %cst_52 = arith.constant 0.000000e+00 : f32
    %136 = vector.shape_cast %41 : vector<16x1xi1> to vector<16x1xi1>
    %137 = vector.broadcast %136 : vector<16x1xi1> to vector<16x128xi1>
    %138 = vector.broadcast %cst_52 : f32 to vector<16x128xf32>
    %139 = arith.select %137, %135, %138 : vector<16x128xi1>, vector<16x128xf32>
    %c11 = arith.constant 11 : index
    %c0_53 = arith.constant 0 : index
    %140 = vector.load %arg6[%c11, %c0_53] : memref<16x128xf32, #tpu.memory_space<vmem>>, vector<1x128xf32>
    %141 = vector.broadcast %140 : vector<1x128xf32> to vector<16x128xf32>
    %142 = arith.mulf %139, %141 : vector<16x128xf32>
    %143 = arith.addf %134, %142 : vector<16x128xf32>
    %c1_i32_54 = arith.constant 1 : i32
    %144 = tpu.dynamic_rotate %139 by %c1_i32_54 dim 0 : vector<16x128xf32>, i32 -> vector<16x128xf32>
    %cst_55 = arith.constant 0.000000e+00 : f32
    %145 = vector.shape_cast %41 : vector<16x1xi1> to vector<16x1xi1>
    %146 = vector.broadcast %145 : vector<16x1xi1> to vector<16x128xi1>
    %147 = vector.broadcast %cst_55 : f32 to vector<16x128xf32>
    %148 = arith.select %146, %144, %147 : vector<16x128xi1>, vector<16x128xf32>
    %c12 = arith.constant 12 : index
    %c0_56 = arith.constant 0 : index
    %149 = vector.load %arg6[%c12, %c0_56] : memref<16x128xf32, #tpu.memory_space<vmem>>, vector<1x128xf32>
    %150 = vector.broadcast %149 : vector<1x128xf32> to vector<16x128xf32>
    %151 = arith.mulf %148, %150 : vector<16x128xf32>
    %152 = arith.addf %143, %151 : vector<16x128xf32>
    %c1_i32_57 = arith.constant 1 : i32
    %153 = tpu.dynamic_rotate %148 by %c1_i32_57 dim 0 : vector<16x128xf32>, i32 -> vector<16x128xf32>
    %cst_58 = arith.constant 0.000000e+00 : f32
    %154 = vector.shape_cast %41 : vector<16x1xi1> to vector<16x1xi1>
    %155 = vector.broadcast %154 : vector<16x1xi1> to vector<16x128xi1>
    %156 = vector.broadcast %cst_58 : f32 to vector<16x128xf32>
    %157 = arith.select %155, %153, %156 : vector<16x128xi1>, vector<16x128xf32>
    %c13 = arith.constant 13 : index
    %c0_59 = arith.constant 0 : index
    %158 = vector.load %arg6[%c13, %c0_59] : memref<16x128xf32, #tpu.memory_space<vmem>>, vector<1x128xf32>
    %159 = vector.broadcast %158 : vector<1x128xf32> to vector<16x128xf32>
    %160 = arith.mulf %157, %159 : vector<16x128xf32>
    %161 = arith.addf %152, %160 : vector<16x128xf32>
    %c1_i32_60 = arith.constant 1 : i32
    %162 = tpu.dynamic_rotate %157 by %c1_i32_60 dim 0 : vector<16x128xf32>, i32 -> vector<16x128xf32>
    %cst_61 = arith.constant 0.000000e+00 : f32
    %163 = vector.shape_cast %41 : vector<16x1xi1> to vector<16x1xi1>
    %164 = vector.broadcast %163 : vector<16x1xi1> to vector<16x128xi1>
    %165 = vector.broadcast %cst_61 : f32 to vector<16x128xf32>
    %166 = arith.select %164, %162, %165 : vector<16x128xi1>, vector<16x128xf32>
    %c14 = arith.constant 14 : index
    %c0_62 = arith.constant 0 : index
    %167 = vector.load %arg6[%c14, %c0_62] : memref<16x128xf32, #tpu.memory_space<vmem>>, vector<1x128xf32>
    %168 = vector.broadcast %167 : vector<1x128xf32> to vector<16x128xf32>
    %169 = arith.mulf %166, %168 : vector<16x128xf32>
    %170 = arith.addf %161, %169 : vector<16x128xf32>
    %c1_i32_63 = arith.constant 1 : i32
    %171 = tpu.dynamic_rotate %166 by %c1_i32_63 dim 0 : vector<16x128xf32>, i32 -> vector<16x128xf32>
    %cst_64 = arith.constant 0.000000e+00 : f32
    %172 = vector.shape_cast %41 : vector<16x1xi1> to vector<16x1xi1>
    %173 = vector.broadcast %172 : vector<16x1xi1> to vector<16x128xi1>
    %174 = vector.broadcast %cst_64 : f32 to vector<16x128xf32>
    %175 = arith.select %173, %171, %174 : vector<16x128xi1>, vector<16x128xf32>
    %c15 = arith.constant 15 : index
    %c0_65 = arith.constant 0 : index
    %176 = vector.load %arg6[%c15, %c0_65] : memref<16x128xf32, #tpu.memory_space<vmem>>, vector<1x128xf32>
    %177 = vector.broadcast %176 : vector<1x128xf32> to vector<16x128xf32>
    %178 = arith.mulf %175, %177 : vector<16x128xf32>
    %179 = arith.addf %170, %178 : vector<16x128xf32>
    %c0_66 = arith.constant 0 : index
    %c0_67 = arith.constant 0 : index
    %180 = vector.load %arg7[%c0_66, %c0_67] : memref<1x128xf32, #tpu.memory_space<vmem>>, vector<1x128xf32>
    %181 = vector.broadcast %180 : vector<1x128xf32> to vector<16x128xf32>
    %182 = arith.mulf %39, %181 : vector<16x128xf32>
    %183 = arith.addf %179, %182 : vector<16x128xf32>
    %184 = arith.mulf %183, %36 : vector<16x128xf32>
    %c0_68 = arith.constant 0 : index
    %c0_69 = arith.constant 0 : index
    %185 = vector.load %arg8[%c0_68, %c0_69] : memref<128x128xf32, #tpu.memory_space<vmem>>, vector<128x128xf32>
    %cst_70 = arith.constant dense<0.000000e+00> : vector<16x128xf32>
    %186 = tpu.matmul %184, %185, %cst_70 {dimension_numbers = #tpu.dot_dimension_numbers<[1], [0], [0], [1], [0, 0, 1, 1], [], []>} : vector<16x128xf32>, vector<128x128xf32>, vector<16x128xf32> -> vector<16x128xf32>
    %c0_71 = arith.constant 0 : index
    %c0_72 = arith.constant 0 : index
    %187 = vector.load %arg9[%c0_71, %c0_72] : memref<1x128xf32, #tpu.memory_space<vmem>>, vector<1x128xf32>
    %188 = vector.broadcast %187 : vector<1x128xf32> to vector<16x128xf32>
    %189 = arith.addf %186, %188 : vector<16x128xf32>
    %c0_73 = arith.constant 0 : index
    %c0_74 = arith.constant 0 : index
    %c0_75 = arith.constant 0 : index
    %190 = vector.load %arg10[%c0_73, %c0_74, %c0_75] : memref<1x16x128xf32, #tpu.memory_space<vmem>>, vector<1x16x128xf32>
    %191 = vector.shape_cast %190 : vector<1x16x128xf32> to vector<16x128xf32>
    %192 = vector.shape_cast %189 : vector<16x128xf32> to vector<1x16x128xf32>
    tpu.vector_store %arg10[%c0_73, %c0_74, %c0_75], %192 {strides = array<i32>} : memref<1x16x128xf32, #tpu.memory_space<vmem>>, vector<1x16x128xf32>,
    return
  }
  func.func @transform_0(%arg0: i32) -> (i32, i32, i32) {
    %c0_i32 = arith.constant 0 : i32
    %c0_i32_0 = arith.constant 0 : i32
    %c0_i32_1 = arith.constant 0 : i32
    return %arg0, %c0_i32, %c0_i32_0 : i32, i32, i32
  }
  func.func @transform_1(%arg0: i32) -> (i32, i32) {
    %c0_i32 = arith.constant 0 : i32
    %c0_i32_0 = arith.constant 0 : i32
    %c0_i32_1 = arith.constant 0 : i32
    return %c0_i32, %c0_i32_0 : i32, i32
  }
  func.func @transform_2(%arg0: i32) -> (i32, i32) {
    %c0_i32 = arith.constant 0 : i32
    %c0_i32_0 = arith.constant 0 : i32
    %c0_i32_1 = arith.constant 0 : i32
    return %c0_i32, %c0_i32_0 : i32, i32
  }
  func.func @transform_3(%arg0: i32) -> (i32, i32) {
    %c0_i32 = arith.constant 0 : i32
    %c0_i32_0 = arith.constant 0 : i32
    %c0_i32_1 = arith.constant 0 : i32
    return %c0_i32, %c0_i32_0 : i32, i32
  }
  func.func @transform_4(%arg0: i32) -> (i32, i32) {
    %c0_i32 = arith.constant 0 : i32
    %c0_i32_0 = arith.constant 0 : i32
    %c0_i32_1 = arith.constant 0 : i32
    return %c0_i32, %c0_i32_0 : i32, i32
  }
  func.func @transform_5(%arg0: i32) -> (i32, i32) {
    %c0_i32 = arith.constant 0 : i32
    %c0_i32_0 = arith.constant 0 : i32
    %c0_i32_1 = arith.constant 0 : i32
    return %c0_i32, %c0_i32_0 : i32, i32
  }
  func.func @transform_6(%arg0: i32) -> (i32, i32) {
    %c0_i32 = arith.constant 0 : i32
    %c0_i32_0 = arith.constant 0 : i32
    %c0_i32_1 = arith.constant 0 : i32
    return %c0_i32, %c0_i32_0 : i32, i32
  }
  func.func @transform_7(%arg0: i32) -> (i32, i32) {
    %c0_i32 = arith.constant 0 : i32
    %c0_i32_0 = arith.constant 0 : i32
    %c0_i32_1 = arith.constant 0 : i32
    return %c0_i32, %c0_i32_0 : i32, i32
  }
  func.func @transform_8(%arg0: i32) -> (i32, i32) {
    %c0_i32 = arith.constant 0 : i32
    %c0_i32_0 = arith.constant 0 : i32
    %c0_i32_1 = arith.constant 0 : i32
    return %c0_i32, %c0_i32_0 : i32, i32
  }
  func.func @transform_9(%arg0: i32) -> (i32, i32, i32) {
    %c0_i32 = arith.constant 0 : i32
    %c0_i32_0 = arith.constant 0 : i32
    %c0_i32_1 = arith.constant 0 : i32
    return %arg0, %c0_i32, %c0_i32_0 : i32, i32, i32
  }
}

</mosaic_0001>

<bundles_post_ra>
// kernel: tpu_custom_call.1
= control target key start
LH: loop header
LB: loop body
LE: loop exit
PB: predicated region body
PF: predicated region fallthrough
CT: control target
= control target key end

     0   :  { %s2496_s0 = inlined_call_operand.hbm [shape: f32[4,16,128], index: 0, kind: input, shape index: {}]   ;;  %s2497_s1 = inlined_call_operand.hbm [shape: f32[128,384], index: 1, kind: input, shape index: {}]   ;;  %s2498_s2 = inlined_call_operand.hbm [shape: f32[1,384], index: 2, kind: input, shape index: {}]   ;;  %s2499_s3 = inlined_call_operand.hbm [shape: f32[3,384], index: 3, kind: input, shape index: {}]   ;;  %s2500_s4 = inlined_call_operand.hbm [shape: f32[1,384], index: 4, kind: input, shape index: {}]   ;;  %s2501_s5 = inlined_call_operand.vmem [shape: f32[16,128], index: 5, kind: input, shape index: {}]   ;;  %s2502_s6 = inlined_call_operand.vmem [shape: f32[1,128], index: 6, kind: input, shape index: {}]   ;;  %s2503_s7 = inlined_call_operand.hbm [shape: f32[128,128], index: 7, kind: input, shape index: {}]   ;;  %s2504_s8 = inlined_call_operand.vmem [shape: f32[1,128], index: 8, kind: input, shape index: {}]   ;;  %s2505_s9 = inlined_call_operand.hbm [shape: f32[4,16,128], index: 9, kind: output, shape index: {}]  }
   0x1   :  { %2512 = sst [smem:[#allocation19_spill]] %s2505_s9 }
   0x2   :  { %14 = vsyncpa [#allocation3], 0 }
   0x3   :  { %16 = vsyncpa [#allocation3 + $0x1], 0 }
   0x4   :  { %17 = vsyncpa [#allocation6], 0 }
   0x5   :  { %18 = vsyncpa [#allocation9], 0 }
   0x6   :  { %19 = vsyncpa [#allocation12], 0 }
   0x7   :  { %20 = vsyncpa [#allocation4], 0 }
   0x8   :  { %22 = vsyncpa [#allocation4 + $0x1], 0  ;;  %s1942_s30 = smov 0   ;;  %s1944_s10 = smov 0  }
   0x9   :  { %s1946_s11 = smov 0   ;;  %s1948_s12 = smov 0  }
   0xa LB: > { %s1878_s13 = smov [#allocation5]   ;;  %s1963_s15 = sadd.s32 4294967295, %s1876_s12   ;;  %s1876_s12 = sphi %s1948_s12, %s2536_s12   ;;  %s1872_s11 = sphi %s1946_s11, %s2535_s11   ;;  %s1868_s10 = sphi %s1944_s10, %s2534_s10   ;;  %s1864_s30 = sphi %s1942_s30, %s2533_s30  }
   0xb   : > { %s265_s14 = sshll.u32 %s1878_s13, 4  ;;  %p1279_p0 = scmp.ge.s32.totalorder %s1876_s12, 1  ;;  %s1968_s14 = int_to_ptr.vmem [resolvable:$true] %s265_s14 }
   0xc   : > { %p2507_p1 = scmp.eq.s32.totalorder %s1963_s15, 0  ;;  %p253_p2 = scmp.lt.s32.totalorder %s1876_s12, 5 }
   0xd   : > { %s1879_s17 = smov [#allocation8]   ;;  %s1880_s20 = smov [#allocation7]  }
   0xe   : > { %p1970_p3 = pnand %p1279_p0, %p253_p2  ;;  %s290_s18 = sshll.u32 %s1879_s17, 4  ;;  %s1982_s18 = int_to_ptr.vmem [resolvable:$true] %s290_s18 }
   0xf   : > { %s279_s21 = sshll.u32 %s1880_s20, 4  ;;  %s1628_s24 = scalar_lea.hbm %s2497_s1, 6144  ;;  %s1984_s21 = int_to_ptr.vmem [resolvable:$true] %s279_s21 }
  0x10   : > { %s2513_s16 = scalar_select %p1970_p3, 1, 0 }
  0x11   : > { %p1548_p4 = pneg %p1970_p3  ;;  %p1629_p6 = scmp.ne.s32.totalorder %s2497_s1, %s1628_s24 }
  0x12   : > { %p1635_p10 = scmp.lt.u32.totalorder %s1628_s24, %s2497_s1 }
  0x13   : > { %p1978_p5 = pnand %p1548_p4, %p2507_p1 }
  0x15   : > { %p1994_p7 = pneg %p1978_p5 }
  0x17   : > { %p1631_p8 = pnand %p1994_p7, %p1629_p6 }
  0x19   : > { %p1632_p9 = pneg %p1631_p8 }
  0x1b   : > { %p1637_p11 = pnand %p1635_p10, %p1632_p9 }
  0x1d   : > { %1640 = shalt.err (!%p1637_p11)
}
  0x1e   : > { %s1641_s13 = scalar_lea.vmem %s1968_s14, 6144  ;;  %p1649_p2 = scmp.lt.s32.totalorder %s1968_s14, %s1968_s14 }
  0x1f   : > { %p1642_p12 = scmp.ne.s32.totalorder %s1968_s14, %s1641_s13  ;;  %p1650_p4 = scmp.lt.s32.totalorder %s1641_s13, %s1641_s13 }
  0x21   : > { %p1644_p13 = pnand %p1642_p12, %p1994_p7  ;;  %p1651_p6 = por %p1650_p4, %p1649_p2 }
  0x23   : > { %p1645_p0 = pneg %p1644_p13 }
  0x25   : > { %p1652_p8 = pnand %p1651_p6, %p1645_p0 }
  0x27   : > { %1655 = shalt.err (!%p1652_p8)
}
  0x28   : > { %s1881_s17 = smov 384   ;;  %s1882_s20 = smov 24  }
  0x29   : > { %1551 = dma.hbm_to_vmem [thread:$0]  (!%p1978_p5), %s2497_s1, 6144, %s1968_s14, [#allocation6], %s1881_s17, %s1881_s17, %s1882_s20  }
  0x2a   : > { %s1656_s26 = scalar_lea.hbm %s2499_s3, 192 }
  0x2b   : > { %p1657_p9 = scmp.ne.s32.totalorder %s2499_s3, %s1656_s26  ;;  %p1663_p12 = scmp.lt.u32.totalorder %s1656_s26, %s2499_s3 }
  0x2d   : > { %p1659_p10 = pnand %p1657_p9, %p1994_p7 }
  0x2f   : > { %p1660_p11 = pneg %p1659_p10 }
  0x31   : > { %p1665_p13 = pnand %p1663_p12, %p1660_p11 }
  0x33   : > { %1668 = shalt.err (!%p1665_p13)
}
  0x34   : > { %s1669_s14 = scalar_lea.vmem %s1982_s18, 192  ;;  %p1677_p6 = scmp.lt.s32.totalorder %s1982_s18, %s1982_s18 }
  0x35   : > { %p1670_p0 = scmp.ne.s32.totalorder %s1982_s18, %s1669_s14  ;;  %p1678_p8 = scmp.lt.s32.totalorder %s1669_s14, %s1669_s14 }
  0x37   : > { %p1672_p2 = pnand %p1670_p0, %p1994_p7  ;;  %p1679_p9 = por %p1678_p8, %p1677_p6 }
  0x39   : > { %p1673_p4 = pneg %p1672_p2 }
  0x3b   : > { %p1680_p10 = pnand %p1679_p9, %p1673_p4 }
  0x3d   : > { %1683 = shalt.err (!%p1680_p10)
}
  0x3e   : > { %1557 = dma.hbm_to_vmem [thread:$0]  (!%p1978_p5), %s2499_s3, 192, %s1982_s18, [#allocation9]  }
  0x3f   : > { %s1684_s23 = scalar_lea.hbm %s2498_s2, 48 }
  0x40   : > { %p1685_p11 = scmp.ne.s32.totalorder %s2498_s2, %s1684_s23  ;;  %p1691_p0 = scmp.lt.u32.totalorder %s1684_s23, %s2498_s2 }
  0x42   : > { %p1687_p12 = pnand %p1685_p11, %p1994_p7 }
  0x44   : > { %p1688_p13 = pneg %p1687_p12 }
  0x46   : > { %p1693_p2 = pnand %p1691_p0, %p1688_p13 }
  0x48   : > { %1696 = shalt.err (!%p1693_p2)
}
  0x49   : > { %s1697_s18 = scalar_lea.vmem %s1984_s21, 48  ;;  %s1704_s29 = scalar_lea.vmem %s1984_s21, 64 }
  0x4a   : > { %p1698_p4 = scmp.ne.s32.totalorder %s1984_s21, %s1697_s18  ;;  %p1705_p9 = scmp.lt.s32.totalorder %s1984_s21, %s1984_s21 }
  0x4b   : > { %p1706_p10 = scmp.lt.s32.totalorder %s1704_s29, %s1697_s18 }
  0x4c   : > { %p1700_p6 = pnand %p1698_p4, %p1994_p7 }
  0x4d   : > { %p1707_p11 = por %p1706_p10, %p1705_p9 }
  0x4e   : > { %p1701_p8 = pneg %p1700_p6 }
  0x50   : > { %p1708_p12 = pnand %p1707_p11, %p1701_p8 }
  0x52   : > { %1711 = shalt.err (!%p1708_p12)
}
  0x53   : > { %1554 = dma.hbm_to_vmem [thread:$0]  (!%p1978_p5), %s2498_s2, 48, %s1984_s21, [#allocation6]  }
  0x54   : > { %s1883_s9 = smov [#allocation10]   ;;  %s1884_s20 = smov [#allocation11]  }
  0x55   : > { %s301_s17 = sshll.u32 %s1883_s9, 4  ;;  %s317_s22 = sshll.u32 %s1884_s20, 4  ;;  %s302_s17 = int_to_ptr.vmem [resolvable:$true] %s301_s17  ;;  %s318_s22 = int_to_ptr.vmem [resolvable:$true] %s317_s22 }
  0x56   : > { %s1712_s25 = scalar_lea.hbm %s2500_s4, 48 }
  0x57   : > { %p1713_p13 = scmp.ne.s32.totalorder %s2500_s4, %s1712_s25  ;;  %p1719_p4 = scmp.lt.u32.totalorder %s1712_s25, %s2500_s4 }
  0x59   : > { %p1715_p0 = pnand %p1713_p13, %p1994_p7 }
  0x5b   : > { %p1716_p2 = pneg %p1715_p0 }
  0x5d   : > { %p1721_p6 = pnand %p1719_p4, %p1716_p2 }
  0x5f   : > { %1724 = shalt.err (!%p1721_p6)
}
  0x60   : > { %s1725_s21 = scalar_lea.vmem %s302_s17, 48  ;;  %s1732_s13 = scalar_lea.vmem %s302_s17, 64 }
  0x61   : > { %p1726_p8 = scmp.ne.s32.totalorder %s302_s17, %s1725_s21  ;;  %p1733_p11 = scmp.lt.s32.totalorder %s302_s17, %s302_s17 }
  0x62   : > { %p1734_p12 = scmp.lt.s32.totalorder %s1732_s13, %s1725_s21 }
  0x63   : > { %p1728_p9 = pnand %p1726_p8, %p1994_p7 }
  0x64   : > { %p1735_p1 = por %p1734_p12, %p1733_p11 }
  0x65   : > { %p1729_p10 = pneg %p1728_p9 }
  0x67   : > { %p1736_p3 = pnand %p1735_p1, %p1729_p10 }
  0x69   : > { %1739 = shalt.err (!%p1736_p3)
}
  0x6a   : > { %1560 = dma.hbm_to_vmem [thread:$0]  (!%p1978_p5), %s2500_s4, 48, %s302_s17, [#allocation9]  }
  0x6b   : > { %s1740_s24 = scalar_lea.hbm %s2503_s7, 2048 }
  0x6c   : > { %p1741_p13 = scmp.ne.s32.totalorder %s2503_s7, %s1740_s24  ;;  %p1747_p3 = scmp.lt.u32.totalorder %s1740_s24, %s2503_s7 }
  0x6e   : > { %p1743_p0 = pnand %p1741_p13, %p1994_p7 }
  0x70   : > { %p1744_p1 = pneg %p1743_p0 }
  0x72   : > { %p1749_p2 = pnand %p1747_p3, %p1744_p1 }
  0x74   : > { %1752 = shalt.err (!%p1749_p2)
}
  0x75   : > { %s1753_s29 = scalar_lea.vmem %s318_s22, 2048  ;;  %p1761_p9 = scmp.lt.s32.totalorder %s318_s22, %s318_s22 }
  0x76   : > { %p1754_p4 = scmp.ne.s32.totalorder %s318_s22, %s1753_s29  ;;  %p1762_p10 = scmp.lt.s32.totalorder %s1753_s29, %s1753_s29 }
  0x78   : > { %p1756_p6 = pnand %p1754_p4, %p1994_p7  ;;  %p1763_p11 = por %p1762_p10, %p1761_p9 }
  0x7a   : > { %p1757_p8 = pneg %p1756_p6 }
  0x7c   : > { %p1764_p12 = pnand %p1763_p11, %p1757_p8 }
  0x7e   : > { %1767 = shalt.err (!%p1764_p12)
}
  0x7f   : > { %s2509_s17 = smov 128   ;;  %s2510_s27 = smov 8  }
  0x80   : > { %1563 = dma.hbm_to_vmem [thread:$0]  (!%p1978_p5), %s2503_s7, 2048, %s318_s22, [#allocation12], %s2509_s17, %s2509_s17, %s2510_s27  }
  0x81   : > { %s1278_s14 = sadd.s32 4294967294, %s1876_s12   ;;  %s2103_s9 = sadd.s32 1, %s1876_s12  }
  0x82   : > { %s35_s20 = sadd.s32 1, %s1872_s11  ;;  %s32_s23 = ssub.s32 %s1876_s12, %s2103_s9 }
  0x83   : > { %p42_p7 = scmp.ne.s32.totalorder %s1872_s11, %s1868_s10  ;;  %p33_p13 = scmp.eq.s32.totalorder %s32_s23, 0 }
  0x84   : > { %p43_p0 = scmp.eq.s32.totalorder %s1876_s12, 0  ;;  %p48_p1 = scmp.ne.s32.totalorder %s1868_s10, %s1864_s30 }
  0x85   : > { %p240_p3 = scmp.eq.s32.totalorder %s1963_s15, 3  ;;  %p2516_p4 = scmp.eq.s32.totalorder %s1963_s15, 0 }
  0x86   : > { %s2115_s19 = scalar_select %p33_p13, %s1872_s11, %s35_s20  }
  0x87   : > { %p44_p2 = por %p43_p0, %p42_p7  ;;  %p2119_p6 = por %p2516_p4, %p48_p1 }
  0x88   : > { %p2123_p5 = por %p240_p3, %p42_p7  ;;  %p246_p8 = scmp.eq.s32.totalorder %s1278_s14, 3 }
  0x89   : > { %p1577_p9 = scmp.lt.s32.totalorder %s1876_s12, 4  ;;  %s334_s25 = sand.u32 1, %s1872_s11  }
  0x8a   : > { %s2518_s22 = scalar_select %p2123_p5, 1, 0 }
  0x8b   : > { %p2129_p10 = por %p246_p8, %p48_p1  ;;  %s1286_s28 = sshll.u32 %s334_s25, 4 }
  0x8c   : > { %s1320_s18 = sshll.u32 %s1876_s12, 8  ;;  %s338_s20 = scalar_lea.vmem [#allocation2], %s1286_s28 }
  0x8d   : > { %s2519_s26 = scalar_select %p2129_p10, 1, 0 }
  0x8e   : > { %s2137_s13 = scalar_lea.hbm %s2496_s0, %s1320_s18  ;;  %s345_s23 = sshll.u32 %s338_s20, 4  ;;  %s2143_s23 = int_to_ptr.vmem [resolvable:$true] %s345_s23 }
  0x8f   : > { %p2139_p11 = pnand %p1577_p9, %p44_p2  ;;  %s2145_s17 = scalar_lea.sflag [#allocation3], %s334_s25 }
  0x90   : > { %s1768_s27 = scalar_lea.hbm %s2137_s13, 256  ;;  %s1773_s29 = scalar_lea.hbm %s2496_s0, 1024 }
  0x91   : > { %p1769_p12 = scmp.ne.s32.totalorder %s2137_s13, %s1768_s27  ;;  %p1770_p7 = pneg %p2139_p11 }
  0x92   : > { %p1774_p1 = scmp.lt.u32.totalorder %s2137_s13, %s2496_s0  ;;  %p1775_p3 = scmp.lt.u32.totalorder %s1773_s29, %s1768_s27 }
  0x93   : > { %p1771_p13 = pnand %p1770_p7, %p1769_p12  ;;  %p1777_p4 = scmp.lt.u32.totalorder %s1768_s27, %s2137_s13 }
  0x94   : > { %p1776_p2 = por %p1775_p3, %p1774_p1 }
  0x95   : > { %p1772_p0 = pneg %p1771_p13 }
  0x96   : > { %p1778_p8 = por %p1777_p4, %p1776_p2 }
  0x98   : > { %p1779_p9 = pnand %p1778_p8, %p1772_p0 }
  0x9a   : > { %1782 = shalt.err (!%p1779_p9)
}
  0x9b   : > { %s1783_s25 = scalar_lea.vmem %s2143_s23, 256  ;;  %s1887_s28 = smov [#allocation2]  }
  0x9c   : > { %p1784_p12 = scmp.ne.s32.totalorder %s2143_s23, %s1783_s25  ;;  %s1788_s18 = sshll.u32 %s1887_s28, 4  ;;  %s1789_s18 = int_to_ptr.vmem [resolvable:$false] %s1788_s18 }
  0x9d   : > { %s1790_s21 = scalar_lea.vmem %s1789_s18, 512  ;;  %p1791_p5 = scmp.lt.s32.totalorder %s2143_s23, %s1789_s18 }
  0x9e   : > { %p1786_p13 = pnand %p1784_p12, %p1770_p7  ;;  %p1792_p1 = scmp.lt.s32.totalorder %s1790_s21, %s1783_s25 }
  0xa0   : > { %p1787_p10 = pneg %p1786_p13  ;;  %p1793_p3 = por %p1792_p1, %p1791_p5 }
  0xa2   : > { %p1794_p2 = pnand %p1793_p3, %p1787_p10 }
  0xa4   : > { %1797 = shalt.err (!%p1794_p2)
}
  0xa5   : > { %s2521_s27 = smov 8   ;;  %s2522_s29 = smov 128  }
  0xa6   : > { %1567 = dma.hbm_to_vmem [thread:$0]  (!%p2139_p11), %s2137_s13, 256, %s2143_s23, %s2145_s17, %s2522_s29, %s2522_s29, %s2521_s27  }
  0xa7   : > { %p2523_p7 = scmp.ne.s32.totalorder %s2513_s16, 0 }
  0xa8   : > { %s2179_s20 = sand.u32 (!%p2523_p7), 1, %s1868_s10  }
  0xa9   : > { %357 = sbr.rel (%p2523_p7) target bundleno = 759 (0x2f7), region = 56  ;;  %s1290_s25 = sshll.u32 (!%p2523_p7), %s2179_s20, 4 }
  0xaa   : > { %s360_s28 = scalar_lea.sflag (!%p2523_p7), [#allocation3], %s2179_s20  ;;  %s2185_s14 = scalar_lea.vmem (!%p2523_p7), [#allocation2], %s1290_s25 }
  0xb0   : > { %1843 = dma.done.wait (%p2119_p6), %s360_s28, 256  }
  0xb1   : > { %1845 = vsyncadd (%p2119_p6), %s360_s28, 4294967040  ;;  %p2524_p5 = scmp.eq.s32.totalorder %s1963_s15, 0 }
  0xb3   : > { %1847 = dma.done.wait (%p2524_p5), [#allocation6], 6192   ;;  %p2525_p10 = pmov %p2524_p5 }
  0xb4   : > { %p2526_p11 = pmov %p2524_p5 }
  0xb5   : > { %1849 = vsyncadd (%p2525_p10), [#allocation6], 4294961104 }
  0xb6   : > { %1851 = dma.done.wait (%p2526_p11), [#allocation9], 240   ;;  %p2527_p0 = pmov %p2524_p5 }
  0xb8   : > { %1853 = vsyncadd (%p2527_p0), [#allocation9], 4294967056  ;;  %p2528_p4 = pmov %p2527_p0 }
  0xb9   : > { %p2529_p8 = pmov %p2527_p0 }
  0xba   : > { %1855 = dma.done.wait (%p2528_p4), [#allocation12], 2048  }
  0xbb   : > { %1857 = vsyncadd (%p2529_p8), [#allocation12], 4294965248  ;;  %v1888_v0 = vmov 0.0   ;;  %v421_v1 = vld [vmem:[#allocation5 + $0x8] sm:$0xff]  ;;  %v424_v2 = vld [vmem:[#allocation5 + $0x20] sm:$0xff]  ;;  %s417_s17 = scalar_lea.vmem [#allocation13], %s1290_s25 }
  0xbc   : > { %549 = vmatprep.mubr.f32.mxu0 %v1888_v0  ;;  %v422_v3 = vld [vmem:[#allocation5 + $0x10] sm:$0xff]  ;;  %v1428_v4 = vpack.c.bf16 %v424_v2, %v421_v1  ;;  %v425_v5 = vld [vmem:[#allocation5 + $0x28] sm:$0xff]  ;;  %v420_v6 = vld [vmem:[#allocation5] sm:$0xff]  ;;  %s1157_s24 = sshll.u32 %s417_s17, 4  ;;  %s1321_s18 = sshll.u32 %s1963_s15, 8  ;;  %s2448_s24 = int_to_ptr.vmem [resolvable:$true] %s1157_s24 }
  0xbd   : > { %v423_v7 = vld [vmem:[#allocation5 + $0x18] sm:$0xff]  ;;  %v1460_v8 = vpack.c.bf16 %v425_v5, %v422_v3  ;;  %v430_v11 = vld [vmem:[#allocation5 + $0x50] sm:$0xff]  ;;  %v428_v12 = vld [vmem:[#allocation5 + $0x40] sm:$0xff]  ;;  %s2530_s29 = sld [smem:[#allocation19_spill]]  ;;  %s1144_s25 = scalar_lea.sflag [#allocation4], %s2179_s20 }
  0xbe   : > { %v1430_v9 = vpack.c.bf16 %v423_v7, %v420_v6  ;;  %v427_v10 = vld [vmem:[#allocation5 + $0x38] sm:$0xff]  ;;  %1429 = vmatprep.subr.bf16.mxu0 %v1428_v4  ;;  %v426_v15 = vld [vmem:[#allocation5 + $0x30] sm:$0xff]  ;;  %v429_v16 = vld [vmem:[#allocation5 + $0x48] sm:$0xff]  ;;  %p2531_p9 = scmp.ne.s32.totalorder %s2518_s22, 0  ;;  %s1889_s15 = smov [#allocation13]  }
  0xbf   : > { %v1432_v13 = vpack.c.bf16 %v430_v11, %v427_v10  ;;  %v431_v14 = vld [vmem:[#allocation5 + $0x58] sm:$0xff]  ;;  %1461 = vmatprep.subr.bf16.mxu1 %v1460_v8  ;;  %v1434_v18 = vpack.c.bf16 %v429_v16, %v426_v15  ;;  %v433_v19 = vld [vmem:[#allocation5 + $0x68] sm:$0xff]  ;;  %v436_v20 = vld [vmem:[#allocation5 + $0x80] sm:$0xff]  ;;  %s1802_s16 = sshll.u32 %s1889_s15, 4  ;;  %s1803_s16 = int_to_ptr.vmem [resolvable:$false] %s1802_s16 }
  0xc0   : > { %1431 = vmatpush1.bf16.msra.mxu0 %v1430_v9  ;;  %v1464_v17 = vpack.c.bf16 %v431_v14, %v428_v12  ;;  %v434_v21 = vld [vmem:[#allocation5 + $0x70] sm:$0xff]  ;;  %1463 = vmatpush3.bf16.msra.mxu1 %v1460_v8  ;;  %v1436_v22 = vpack.c.bf16 %v436_v20, %v433_v19  ;;  %v437_v23 = vld [vmem:[#allocation5 + $0x88] sm:$0xff]  ;;  %v432_v24 = vld [vmem:[#allocation5 + $0x60] sm:$0xff]  ;;  %s1804_s13 = scalar_lea.vmem %s1803_s16, 512  ;;  %p1805_p1 = scmp.lt.s32.totalorder %s2448_s24, %s1803_s16 }
  0xc1   : > { %1433 = vmatprep.subr.bf16.mxu0 %v1432_v13  ;;  %v435_v25 = vld [vmem:[#allocation5 + $0x78] sm:$0xff]  ;;  %v1468_v26 = vpack.c.bf16 %v437_v23, %v434_v21  ;;  %v442_v28 = vld [vmem:[#allocation5 + $0xb0] sm:$0xff]  ;;  %v440_v29 = vld [vmem:[#allocation5 + $0xa0] sm:$0xff] }
  0xc2   : > { %1465 = vmatprep.subr.bf16.mxu1 %v1464_v17  ;;  %v439_v27 = vld [vmem:[#allocation5 + $0x98] sm:$0xff]  ;;  %v1438_v31 = vpack.c.bf16 %v435_v25, %v432_v24  ;;  %v438_v33 = vld [vmem:[#allocation5 + $0x90] sm:$0xff]  ;;  %v441_v34 = vld [vmem:[#allocation5 + $0xa8] sm:$0xff] }
  0xc3   : > { %v443_v30 = vld [vmem:[#allocation5 + $0xb8] sm:$0xff]  ;;  %v1440_v32 = vpack.c.bf16 %v442_v28, %v439_v27  ;;  %v445_v36 = vld [vmem:[#allocation5 + $0xc8] sm:$0xff]  ;;  %v448_v37 = vld [vmem:[#allocation5 + $0xe0] sm:$0xff]  ;;  %v1442_v40 = vpack.c.bf16 %v441_v34, %v438_v33  ;;  %s2453_s28 = scalar_lea.hbm %s2530_s29, %s1321_s18 }
  0xc4   : > { %1435 = vmatpush1.bf16.msra.mxu0 %v1434_v18  ;;  %1467 = vmatpush3.bf16.msra.mxu1 %v1464_v17  ;;  %v1472_v35 = vpack.c.bf16 %v443_v30, %v440_v29  ;;  %v446_v38 = vld [vmem:[#allocation5 + $0xd0] sm:$0xff]  ;;  %v449_v39 = vld [vmem:[#allocation5 + $0xe8] sm:$0xff]  ;;  %v1444_v41 = vpack.c.bf16 %v448_v37, %v445_v36  ;;  %v444_v42 = vld [vmem:[#allocation5 + $0xc0] sm:$0xff] }
  0xc5   : > { %1437 = vmatprep.subr.bf16.mxu0 %v1436_v22  ;;  %1469 = vmatprep.subr.bf16.mxu1 %v1468_v26  ;;  %v447_v43 = vld [vmem:[#allocation5 + $0xd8] sm:$0xff]  ;;  %v1476_v44 = vpack.c.bf16 %v449_v39, %v446_v38  ;;  %v454_v46 = vld [vmem:[#allocation5 + $0x110] sm:$0xff]  ;;  %v452_v47 = vld [vmem:[#allocation5 + $0x100] sm:$0xff] }
  0xc6   : > { %v451_v45 = vld [vmem:[#allocation5 + $0xf8] sm:$0xff]  ;;  %v1446_v49 = vpack.c.bf16 %v447_v43, %v444_v42  ;;  %v418_v50 = vld [vmem:[%s2185_s14] sm:$0xff]  ;;  %v453_v53 = vld [vmem:[#allocation5 + $0x108] sm:$0xff] }
  0xc7   : > { %v455_v48 = vld [vmem:[#allocation5 + $0x118] sm:$0xff]  ;;  %v1448_v51 = vpack.c.bf16 %v454_v46, %v451_v45  ;;  %v450_v52 = vld [vmem:[#allocation5 + $0xf0] sm:$0xff]  ;;  %v457_v55 = vld [vmem:[#allocation5 + $0x128] sm:$0xff]  ;;  %1390 = vmatprep.mubr.f32.mxu1 %v418_v50 }
  0xc8   : > { %1439 = vmatpush1.bf16.msra.mxu0 %v1438_v31  ;;  %1471 = vmatpush3.bf16.msra.mxu1 %v1468_v26  ;;  %v1480_v54 = vpack.c.bf16 %v455_v48, %v452_v47  ;;  %v460_v56 = vld [vmem:[#allocation5 + $0x140] sm:$0xff]  ;;  %v458_v57 = vld [vmem:[#allocation5 + $0x130] sm:$0xff]  ;;  %v461_v58 = vld [vmem:[#allocation5 + $0x148] sm:$0xff]  ;;  %v1450_v59 = vpack.c.bf16 %v453_v53, %v450_v52 }
  0xc9   : > { %1441 = vmatprep.subr.bf16.mxu0 %v1440_v32  ;;  %1473 = vmatprep.subr.bf16.mxu1 %v1472_v35  ;;  %v1452_v60 = vpack.c.bf16 %v460_v56, %v457_v55  ;;  %v456_v61 = vld [vmem:[#allocation5 + $0x120] sm:$0xff]  ;;  %v459_v62 = vld [vmem:[#allocation5 + $0x138] sm:$0xff]  ;;  %v1484_v63 = vpack.c.bf16 %v461_v58, %v458_v57  ;;  %v466_v2 = vld [vmem:[#allocation5 + $0x170] sm:$0xff] }
  0xca   : > { %v463_v1 = vld [vmem:[#allocation5 + $0x158] sm:$0xff]  ;;  %v464_v3 = vld [vmem:[#allocation5 + $0x160] sm:$0xff]  ;;  %v1454_v5 = vpack.c.bf16 %v459_v62, %v456_v61  ;;  %v462_v7 = vld [vmem:[#allocation5 + $0x150] sm:$0xff] }
  0xcb   : > { %v467_v4 = vld [vmem:[#allocation5 + $0x178] sm:$0xff]  ;;  %v1456_v6 = vpack.c.bf16 %v466_v2, %v463_v1  ;;  %v465_v8 = vld [vmem:[#allocation5 + $0x168] sm:$0xff]  ;;  %v468_v38 = vld [vmem:[#allocation7] sm:$0x7] }
  0xcc   : > { %1443 = vmatpush1.bf16.msra.mxu0 %v1442_v40  ;;  %1475 = vmatpush3.bf16.msra.mxu1 %v1472_v35  ;;  %v1488_v9 = vpack.c.bf16 %v467_v4, %v464_v3  ;;  %v1458_v10 = vpack.c.bf16 %v465_v8, %v462_v7  ;;  %v419_v11 = vld [vmem:[%s2185_s14 + $0x8] sm:$0xff]  ;;  %v470_v35 = vlaneseq  ;;  %s1798_s14 = scalar_lea.vmem %s2448_s24, 256 }
  0xcd   : > { %1445 = vmatprep.subr.bf16.mxu0 %v1444_v41  ;;  %1477 = vmatprep.subr.bf16.mxu1 %v1476_v44  ;;  %v1043_v12 = vld [vmem:[#allocation11] sm:$0xff]  ;;  %v1044_v13 = vld [vmem:[#allocation11 + $0x8] sm:$0xff]  ;;  %v1045_v14 = vld [vmem:[#allocation11 + $0x10] sm:$0xff]  ;;  %p1799_p6 = scmp.ne.s32.totalorder %s2448_s24, %s1798_s14  ;;  %p1806_p3 = scmp.lt.s32.totalorder %s1804_s13, %s1798_s14 }
  0xce   : > { %v1492_v15 = vpack.c.bf16 %v1044_v13, %v1043_v12  ;;  %v1046_v16 = vld [vmem:[#allocation11 + $0x18] sm:$0xff]  ;;  %v1047_v18 = vld [vmem:[#allocation11 + $0x20] sm:$0xff]  ;;  %v1048_v19 = vld [vmem:[#allocation11 + $0x28] sm:$0xff]  ;;  %v2207_v36 = vshrl.u32 %v470_v35, 7 }
  0xcf   : > { %v1496_v17 = vpack.c.bf16 %v1046_v16, %v1045_v14  ;;  %v1500_v20 = vpack.c.bf16 %v1048_v19, %v1047_v18  ;;  %v1049_v21 = vld [vmem:[#allocation11 + $0x30] sm:$0xff]  ;;  %v1050_v22 = vld [vmem:[#allocation11 + $0x38] sm:$0xff]  ;;  %v1051_v24 = vld [vmem:[#allocation11 + $0x40] sm:$0xff]  ;;  %p1800_p12 = pnand %p1799_p6, %p2531_p9  ;;  %p1807_p2 = por %p1806_p3, %p1805_p1 }
  0xd0   : > { %1447 = vmatpush1.bf16.msra.mxu0 %v1446_v49  ;;  %1479 = vmatpush3.bf16.msra.mxu1 %v1476_v44  ;;  %v1504_v23 = vpack.c.bf16 %v1050_v22, %v1049_v21  ;;  %v1053_v26 = vld [vmem:[#allocation11 + $0x50] sm:$0xff]  ;;  %v1054_v27 = vld [vmem:[#allocation11 + $0x58] sm:$0xff]  ;;  %v1055_v29 = vld [vmem:[#allocation11 + $0x60] sm:$0xff]  ;;  %v2210_v37 = vsub.s32 0, %v2207_v36  ;;  %v2213_v39 = vsub.s32 2, %v2207_v36  ;;  %v2216_v40 = vsub.s32 1, %v2207_v36 }
  0xd1   : > { %1449 = vmatprep.subr.bf16.mxu0 %v1448_v51  ;;  %1481 = vmatprep.subr.bf16.mxu1 %v1480_v54  ;;  %v1512_v28 = vpack.c.bf16 %v1054_v27, %v1053_v26  ;;  %v1056_v30 = vld [vmem:[#allocation11 + $0x68] sm:$0xff]  ;;  %v1057_v32 = vld [vmem:[#allocation11 + $0x70] sm:$0xff]  ;;  %v1058_v33 = vld [vmem:[#allocation11 + $0x78] sm:$0xff]  ;;  %vm640_vm0 = vcmp.ge.s32.totalorder %v2207_v36, 1  ;;  %vm648_vm1 = vcmp.lt.s32.totalorder %v2207_v36, 1  ;;  %vm673_vm2 = vcmp.lt.s32.totalorder %v2207_v36, 2  ;;  %p1801_p13 = pneg %p1800_p12 }
  0xd2   : > { %v1516_v31 = vpack.c.bf16 %v1056_v30, %v1055_v29  ;;  %v1520_v34 = vpack.c.bf16 %v1058_v33, %v1057_v32  ;;  %v744_v41 = vld [vmem:[#allocation8 + $0x2] ss:$4 sm:$0x7]  ;;  %v473_v42 = vrot.slane %v468_v38, %v2210_v37  ;;  %v481_v43 = vrot.slane %v468_v38, %v2213_v39  ;;  %v690_v45 = vld [vmem:[#allocation8] ss:$4 sm:$0x7] }
  0xd3   : > { %v477_v44 = vrot.slane %v468_v38, %v2216_v40  ;;  %v714_v46 = vld [vmem:[#allocation8 + $0x1] ss:$4 sm:$0x7]  ;;  %v749_v47 = vrot.slane %v744_v41, %v2210_v37  ;;  %v757_v49 = vrot.slane %v744_v41, %v2213_v39  ;;  %vm665_vm3 = vcmp.ge.s32.totalorder %v2207_v36, 2  ;;  %v1314_v36 = vld [vmem:[%s2504_s8] ss:$0 sm:$0xff]  ;;  %p1808_p7 = pnand %p1807_p2, %p1801_p13 }
  0xd4   : > { %1451 = vmatpush1.bf16.msra.mxu0 %v1450_v59  ;;  %1483 = vmatpush3.bf16.msra.mxu1 %v1480_v54  ;;  %v703_v54 = vrot.slane %v690_v45, %v2213_v39  ;;  %v727_v55 = vrot.slane %v714_v46, %v2213_v39  ;;  %v695_v59 = vrot.slane %v690_v45, %v2210_v37 }
  0xd5   : > { %1453 = vmatprep.subr.bf16.mxu0 %v1452_v60  ;;  %1485 = vmatprep.subr.bf16.mxu1 %v1484_v63  ;;  %v719_v60 = vrot.slane %v714_v46, %v2210_v37  ;;  %v723_v1 = vrot.slane %v714_v46, %v2216_v40 }
  0xd8   : > { %1455 = vmatpush1.bf16.msra.mxu0 %v1454_v5  ;;  %1487 = vmatpush3.bf16.msra.mxu1 %v1484_v63  ;;  %v699_v63 = vrot.slane %v690_v45, %v2216_v40 }
  0xd9   : > { %1457 = vmatprep.subr.bf16.mxu0 %v1456_v6  ;;  %1489 = vmatprep.subr.bf16.mxu1 %v1488_v9 }
  0xdc   : > { %1459 = vmatpush1.bf16.msra.mxu0 %v1458_v10  ;;  %1491 = vmatpush3.bf16.msra.mxu1 %v1488_v9 }
  0xdd   : > { %1493 = vmatprep.subr.bf16.mxu0 %v1492_v15 }
  0xdf   : > { %550 = vmatmul.mubr.f32.vlgmr.msra.gmra.mrb[0].mxu0 %v418_v50  ;;  %1391 = vmatmul.mubr.f32.vlgmr.msra.gmra.mrb[0].mxu1 %v419_v11  ;;  %v2226_v50 = vrot.slane %v744_v41, %v2216_v40 }
  0xe0   : > { %555 = vmatprep.mubr.f32.mxu0 %v1888_v0  ;;  %1495 = vmatpush3.bf16.msra.mxu0 %v1492_v15  ;;  %v1052_v0 = vld [vmem:[#allocation11 + $0x48] sm:$0xff] }
  0xe1   : > { %1497 = vmatprep.subr.bf16.mxu0 %v1496_v17  ;;  %v1508_v25 = vpack.c.bf16 %v1052_v0, %v1051_v24 }
  0xe3   : > { %556 = vmatmul.mubr.f32.gmra.mrb[2].mxu0 %v419_v11 }
  0xe4   : > { %1499 = vmatpush3.bf16.msra.mxu0 %v1496_v17 }
  0xe5   : > { %1501 = vmatprep.subr.bf16.mxu0 %v1500_v20 }
  0xe8   : > { %1503 = vmatpush3.bf16.msra.mxu0 %v1500_v20 }
  0xe9   : > { %1505 = vmatprep.subr.bf16.mxu0 %v1504_v23 }
  0xec   : > { %1507 = vmatpush3.bf16.msra.mxu0 %v1504_v23 }
  0xed   : > { %1509 = vmatprep.subr.bf16.mxu0 %v1508_v25 }
  0xf0   : > { %1511 = vmatpush3.bf16.msra.mxu0 %v1508_v25 }
  0xf1   : > { %1513 = vmatprep.subr.bf16.mxu0 %v1512_v28 }
  0xf4   : > { %1515 = vmatpush3.bf16.msra.mxu0 %v1512_v28 }
  0xf5   : > { %1517 = vmatprep.subr.bf16.mxu0 %v1516_v31 }
  0xf8   : > { %1519 = vmatpush3.bf16.msra.mxu0 %v1516_v31 }
  0xf9   : > { %1521 = vmatprep.subr.bf16.mxu0 %v1520_v34 }
  0xfc   : > { %1523 = vmatpush3.bf16.msra.mxu0 %v1520_v34 }
 0x1b2   : > { %v551_v48 = vpop.f32.mrb[0].mxu0  ;;  %v1392_v52 = vpop.f32.mrb[0].mxu1 }
 0x1b3   : > { %v552_v51 = vadd.f32 %v551_v48, %v473_v42  ;;  %v553_v53 = vpop.f32.mrb[1].mxu0  ;;  %v634_v56 = vadd.f32 %v1392_v52, %v481_v43  ;;  %v628_v58 = vpop.f32.mrb[1].mxu1 }
 0x1b4   : > { %v2232_v57 = vadd.f32 %v553_v53, %v477_v44  ;;  %v629_v62 = vadd.f32 %v628_v58, %v481_v43 }
 0x1b5   : > { %v2236_v61 = vmul.f32 %v749_v47, %v552_v51  ;;  %v642_v2 = vrot.slane %v552_v51, 7  ;;  %v667_v3 = vrot.slane %v552_v51, 6  ;;  %v647_v4 = vrot.slane %v634_v56, 7 }
 0x1b6   : > { %v672_v5 = vrot.slane %v634_v56, 6  ;;  %v557_v6 = vpop.f32.mrb[2].mxu0  ;;  %v766_v7 = vmul.f32 %v757_v49, %v634_v56  ;;  %v643_v8 = vrot.slane %v2232_v57, 7  ;;  %v644_v9 = vrot.slane %v629_v62, 7 }
 0x1b7   : > { %v669_v10 = vrot.slane %v629_v62, 6  ;;  %v559_v11 = vpop.f32.mrb[3].mxu0  ;;  %v668_v12 = vrot.slane %v2232_v57, 6  ;;  %v763_v13 = vmul.f32 %v757_v49, %v629_v62  ;;  %v558_v14 = vadd.f32 %v557_v6, %v473_v42 }
 0x1b8   : > { %v560_v15 = vadd.f32 %v559_v11, %v477_v44  ;;  %v651_v16 = vsel %vm648_vm1, %v644_v9, %v647_v4  ;;  %v654_v17 = vsel %vm648_vm1, %v647_v4, %v644_v9  ;;  %v762_v9 = vmul.f32 %v2226_v50, %v2232_v57 }
 0x1b9   : > { %v676_v18 = vsel %vm673_vm2, %v669_v10, %v672_v5  ;;  %v679_v19 = vsel %vm673_vm2, %v672_v5, %v669_v10  ;;  %v661_v20 = vsel %vm640_vm0, %v654_v17, 0.0  ;;  %v736_v23 = vmul.f32 %v727_v55, %v651_v16 }
 0x1ba   : > { %v686_v21 = vsel %vm665_vm3, %v679_v19, 0.0  ;;  %v712_v22 = vmul.f32 %v703_v54, %v676_v18  ;;  %v733_v0 = vmul.f32 %v727_v55, %v661_v20  ;;  %v645_v25 = vrot.slane %v558_v14, 7 }
 0x1bb   : > { %v709_v24 = vmul.f32 %v703_v54, %v686_v21  ;;  %v670_v26 = vrot.slane %v558_v14, 6  ;;  %v764_v28 = vmul.f32 %v749_v47, %v558_v14  ;;  %v646_v29 = vrot.slane %v560_v15, 7  ;;  %v773_v47 = vld [vmem:[#allocation10] sm:$0x7] }
 0x1bc   : > { %v742_v27 = vadd.f32 %v736_v23, %v712_v22  ;;  %v671_v30 = vrot.slane %v560_v15, 6  ;;  %v649_v32 = vsel %vm648_vm1, %v642_v2, %v645_v25  ;;  %v652_v33 = vsel %vm648_vm1, %v645_v25, %v642_v2 }
 0x1bd   : > { %v739_v31 = vadd.f32 %v733_v0, %v709_v24  ;;  %v674_v34 = vsel %vm673_vm2, %v667_v3, %v670_v26  ;;  %v659_v38 = vsel %vm640_vm0, %v652_v33, 0.0  ;;  %v677_v41 = vsel %vm673_vm2, %v670_v26, %v667_v3  ;;  %v1299_v26 = vld [vmem:[%s2501_s5 + $0x2] ss:$0 sm:$0xff] }
 0x1be   : > { %v772_v35 = vadd.f32 %v766_v7, %v742_v27  ;;  %v710_v42 = vmul.f32 %v695_v59, %v674_v34  ;;  %v684_v44 = vsel %vm665_vm3, %v677_v41, 0.0  ;;  %v731_v45 = vmul.f32 %v719_v60, %v659_v38  ;;  %v1300_v38 = vld [vmem:[%s2501_s5 + $0x3] ss:$0 sm:$0xff] }
 0x1bf   : > { %v769_v43 = vadd.f32 %v763_v13, %v739_v31  ;;  %v734_v46 = vmul.f32 %v719_v60, %v649_v32  ;;  %v707_v48 = vmul.f32 %v695_v59, %v684_v44  ;;  %v650_v49 = vsel %vm648_vm1, %v643_v8, %v646_v29 }
 0x1c0   : > { %v653_v51 = vsel %vm648_vm1, %v646_v29, %v643_v8  ;;  %v675_v52 = vsel %vm673_vm2, %v668_v12, %v671_v30  ;;  %v678_v55 = vsel %vm673_vm2, %v671_v30, %v668_v12  ;;  %v778_v56 = vrot.slane %v773_v47, %v2210_v37 }
 0x1c1   : > { %v740_v53 = vadd.f32 %v734_v46, %v710_v42  ;;  %v660_v54 = vsel %vm640_vm0, %v653_v51, 0.0  ;;  %v685_v58 = vsel %vm665_vm3, %v678_v55, 0.0  ;;  %v711_v59 = vmul.f32 %v699_v63, %v675_v52  ;;  %v1301_v51 = vld [vmem:[%s2501_s5 + $0x4] ss:$0 sm:$0xff] }
 0x1c2   : > { %v732_v60 = vmul.f32 %v723_v1, %v660_v54  ;;  %v735_v62 = vmul.f32 %v723_v1, %v650_v49  ;;  %v786_v2 = vrot.slane %v773_v47, %v2213_v39  ;;  %v708_v4 = vmul.f32 %v699_v63, %v685_v58 }
 0x1c3   : > { %v770_v3 = vadd.f32 %v764_v28, %v740_v53  ;;  %v765_v6 = vmul.f32 %v2226_v50, %v560_v15  ;;  %v782_v7 = vrot.slane %v773_v47, %v2216_v40  ;;  %v737_v8 = vadd.f32 %v731_v45, %v707_v48  ;;  %v1297_v50 = vld [vmem:[%s2501_s5] ss:$0 sm:$0xff] }
 0x1c4   : > { %v741_v5 = vadd.f32 %v735_v62, %v711_v59  ;;  %v738_v37 = vadd.f32 %v732_v60, %v708_v4  ;;  %v795_v39 = vadd.f32 %v786_v2, %v772_v35  ;;  %v792_v63 = vadd.f32 %v786_v2, %v769_v43  ;;  %v1302_v2 = vld [vmem:[%s2501_s5 + $0x5] ss:$0 sm:$0xff] }
 0x1c5   : > { %v2284_v10 = vadd.f32 %v778_v56, %v770_v3  ;;  %v767_v12 = vadd.f32 %v2236_v61, %v737_v8  ;;  %v1298_v61 = vld [vmem:[%s2501_s5 + $0x1] ss:$0 sm:$0xff] }
 0x1c6   : > { %v771_v11 = vadd.f32 %v765_v6, %v741_v5  ;;  %v768_v1 = vadd.f32 %v762_v9, %v738_v37 }
 0x1c7   : > { %v2287_v14 = vadd.f32 %v778_v56, %v767_v12  ;;  %v1303_v12 = vld [vmem:[%s2501_s5 + $0x6] ss:$0 sm:$0xff] }
 0x1c8   : > { %v794_v13 = vadd.f32 %v782_v7, %v771_v11  ;;  %v791_v16 = vadd.f32 %v782_v7, %v768_v1 }
 0x1ca   : > { %v2289_v15 = vmul.f32 %v795_v39, %v794_v13  ;;  %v2291_v40 = vmul.f32 %v792_v63, %v791_v16 }
 0x1cc   : > { %v806_v17 = vrot.slane %v2289_v15, 7  ;;  %v805_v57 = vrot.slane %v2291_v40, 7  ;;  %v804_v20 = vmul.f32 %v1297_v50, %v2289_v15  ;;  %v803_v24 = vmul.f32 %v1297_v50, %v2291_v40 }
 0x1ce   : > { %v807_v18 = vsel %vm648_vm1, %v805_v57, %v806_v17  ;;  %v808_v19 = vsel %vm648_vm1, %v806_v17, %v805_v57 }
 0x1cf   : > { %v809_v21 = vsel %vm640_vm0, %v808_v19, 0.0  ;;  %v817_v22 = vmul.f32 %v1298_v61, %v807_v18  ;;  %v821_v23 = vrot.slane %v807_v18, 7  ;;  %v1304_v18 = vld [vmem:[%s2501_s5 + $0x7] ss:$0 sm:$0xff] }
 0x1d0   : > { %v816_v0 = vmul.f32 %v1298_v61, %v809_v21  ;;  %v820_v25 = vrot.slane %v809_v21, 7 }
 0x1d1   : > { %v819_v27 = vadd.f32 %v817_v22, %v804_v20 }
 0x1d2   : > { %v818_v28 = vadd.f32 %v816_v0, %v803_v24  ;;  %v822_v29 = vsel %vm648_vm1, %v820_v25, %v821_v23  ;;  %v823_v30 = vsel %vm648_vm1, %v821_v23, %v820_v25 }
 0x1d3   : > { %v824_v31 = vsel %vm640_vm0, %v823_v30, 0.0  ;;  %v832_v32 = vmul.f32 %v1299_v26, %v822_v29  ;;  %v836_v33 = vrot.slane %v822_v29, 7 }
 0x1d4   : > { %v831_v34 = vmul.f32 %v1299_v26, %v824_v31  ;;  %v835_v35 = vrot.slane %v824_v31, 7 }
 0x1d5   : > { %v834_v41 = vadd.f32 %v832_v32, %v819_v27  ;;  %v1305_v27 = vld [vmem:[%s2501_s5 + $0x8] ss:$0 sm:$0xff] }
 0x1d6   : > { %v833_v42 = vadd.f32 %v831_v34, %v818_v28  ;;  %v837_v43 = vsel %vm648_vm1, %v835_v35, %v836_v33  ;;  %v838_v44 = vsel %vm648_vm1, %v836_v33, %v835_v35 }
 0x1d7   : > { %v839_v45 = vsel %vm640_vm0, %v838_v44, 0.0  ;;  %v847_v46 = vmul.f32 %v1300_v38, %v837_v43  ;;  %v851_v47 = vrot.slane %v837_v43, 7 }
 0x1d8   : > { %v846_v48 = vmul.f32 %v1300_v38, %v839_v45  ;;  %v850_v49 = vrot.slane %v839_v45, 7 }
 0x1d9   : > { %v849_v52 = vadd.f32 %v847_v46, %v834_v41  ;;  %v1306_v41 = vld [vmem:[%s2501_s5 + $0x9] ss:$0 sm:$0xff] }
 0x1da   : > { %v848_v53 = vadd.f32 %v846_v48, %v833_v42  ;;  %v852_v54 = vsel %vm648_vm1, %v850_v49, %v851_v47  ;;  %v853_v55 = vsel %vm648_vm1, %v851_v47, %v850_v49 }
 0x1db   : > { %v854_v56 = vsel %vm640_vm0, %v853_v55, 0.0  ;;  %v862_v58 = vmul.f32 %v1301_v51, %v852_v54  ;;  %v866_v59 = vrot.slane %v852_v54, 7 }
 0x1dc   : > { %v861_v60 = vmul.f32 %v1301_v51, %v854_v56  ;;  %v865_v62 = vrot.slane %v854_v56, 7 }
 0x1dd   : > { %v864_v3 = vadd.f32 %v862_v58, %v849_v52  ;;  %v1307_v52 = vld [vmem:[%s2501_s5 + $0xa] ss:$0 sm:$0xff] }
 0x1de   : > { %v863_v4 = vadd.f32 %v861_v60, %v848_v53  ;;  %v867_v5 = vsel %vm648_vm1, %v865_v62, %v866_v59  ;;  %v868_v6 = vsel %vm648_vm1, %v866_v59, %v865_v62 }
 0x1df   : > { %v869_v7 = vsel %vm640_vm0, %v868_v6, 0.0  ;;  %v877_v8 = vmul.f32 %v1302_v2, %v867_v5  ;;  %v881_v9 = vrot.slane %v867_v5, 7 }
 0x1e0   : > { %v876_v37 = vmul.f32 %v1302_v2, %v869_v7  ;;  %v880_v11 = vrot.slane %v869_v7, 7 }
 0x1e1   : > { %v879_v1 = vadd.f32 %v877_v8, %v864_v3  ;;  %v1308_v3 = vld [vmem:[%s2501_s5 + $0xb] ss:$0 sm:$0xff] }
 0x1e2   : > { %v878_v13 = vadd.f32 %v876_v37, %v863_v4  ;;  %v882_v39 = vsel %vm648_vm1, %v880_v11, %v881_v9  ;;  %v883_v63 = vsel %vm648_vm1, %v881_v9, %v880_v11 }
 0x1e3   : > { %v884_v16 = vsel %vm640_vm0, %v883_v63, 0.0  ;;  %v892_v17 = vmul.f32 %v1303_v12, %v882_v39  ;;  %v896_v50 = vrot.slane %v882_v39, 7 }
 0x1e4   : > { %v891_v57 = vmul.f32 %v1303_v12, %v884_v16  ;;  %v895_v61 = vrot.slane %v884_v16, 7 }
 0x1e5   : > { %v894_v19 = vadd.f32 %v892_v17, %v879_v1  ;;  %v1309_v1 = vld [vmem:[%s2501_s5 + $0xc] ss:$0 sm:$0xff] }
 0x1e6   : > { %v893_v20 = vadd.f32 %v891_v57, %v878_v13  ;;  %v897_v21 = vsel %vm648_vm1, %v895_v61, %v896_v50  ;;  %v898_v22 = vsel %vm648_vm1, %v896_v50, %v895_v61 }
 0x1e7   : > { %v899_v23 = vsel %vm640_vm0, %v898_v22, 0.0  ;;  %v907_v24 = vmul.f32 %v1304_v18, %v897_v21  ;;  %v911_v0 = vrot.slane %v897_v21, 7 }
 0x1e8   : > { %v906_v25 = vmul.f32 %v1304_v18, %v899_v23  ;;  %v910_v26 = vrot.slane %v899_v23, 7 }
 0x1e9   : > { %v909_v28 = vadd.f32 %v907_v24, %v894_v19  ;;  %v1310_v19 = vld [vmem:[%s2501_s5 + $0xd] ss:$0 sm:$0xff] }
 0x1ea   : > { %v908_v29 = vadd.f32 %v906_v25, %v893_v20  ;;  %v912_v30 = vsel %vm648_vm1, %v910_v26, %v911_v0  ;;  %v913_v31 = vsel %vm648_vm1, %v911_v0, %v910_v26 }
 0x1eb   : > { %v914_v32 = vsel %vm640_vm0, %v913_v31, 0.0  ;;  %v922_v33 = vmul.f32 %v1305_v27, %v912_v30  ;;  %v926_v34 = vrot.slane %v912_v30, 7 }
 0x1ec   : > { %v921_v35 = vmul.f32 %v1305_v27, %v914_v32  ;;  %v925_v38 = vrot.slane %v914_v32, 7 }
 0x1ed   : > { %v924_v42 = vadd.f32 %v922_v33, %v909_v28  ;;  %v1311_v28 = vld [vmem:[%s2501_s5 + $0xe] ss:$0 sm:$0xff] }
 0x1ee   : > { %v923_v43 = vadd.f32 %v921_v35, %v908_v29  ;;  %v927_v44 = vsel %vm648_vm1, %v925_v38, %v926_v34  ;;  %v928_v45 = vsel %vm648_vm1, %v926_v34, %v925_v38 }
 0x1ef   : > { %v929_v46 = vsel %vm640_vm0, %v928_v45, 0.0  ;;  %v937_v47 = vmul.f32 %v1306_v41, %v927_v44  ;;  %v941_v48 = vrot.slane %v927_v44, 7 }
 0x1f0   : > { %v936_v49 = vmul.f32 %v1306_v41, %v929_v46  ;;  %v940_v51 = vrot.slane %v929_v46, 7 }
 0x1f1   : > { %v939_v53 = vadd.f32 %v937_v47, %v924_v42  ;;  %v1312_v42 = vld [vmem:[%s2501_s5 + $0xf] ss:$0 sm:$0xff]  ;;  %v1313_v47 = vld [vmem:[%s2502_s6] ss:$0 sm:$0xff] }
 0x1f2   : > { %v938_v54 = vadd.f32 %v936_v49, %v923_v43  ;;  %v942_v55 = vsel %vm648_vm1, %v940_v51, %v941_v48  ;;  %v943_v56 = vsel %vm648_vm1, %v941_v48, %v940_v51 }
 0x1f3   : > { %v944_v58 = vsel %vm640_vm0, %v943_v56, 0.0  ;;  %v952_v59 = vmul.f32 %v1307_v52, %v942_v55  ;;  %v956_v60 = vrot.slane %v942_v55, 7  ;;  %v1037_v55 = vmul.f32 %v1313_v47, %v2291_v40 }
 0x1f4   : > { %v951_v62 = vmul.f32 %v1307_v52, %v944_v58  ;;  %v955_v2 = vrot.slane %v944_v58, 7 }
 0x1f5   : > { %v954_v4 = vadd.f32 %v952_v59, %v939_v53  ;;  %v1038_v53 = vmul.f32 %v1313_v47, %v2289_v15 }
 0x1f6   : > { %v953_v5 = vadd.f32 %v951_v62, %v938_v54  ;;  %v957_v6 = vsel %vm648_vm1, %v955_v2, %v956_v60  ;;  %v958_v7 = vsel %vm648_vm1, %v956_v60, %v955_v2 }
 0x1f7   : > { %v959_v8 = vsel %vm640_vm0, %v958_v7, 0.0  ;;  %v967_v9 = vmul.f32 %v1308_v3, %v957_v6  ;;  %v971_v37 = vrot.slane %v957_v6, 7 }
 0x1f8   : > { %v966_v11 = vmul.f32 %v1308_v3, %v959_v8  ;;  %v970_v12 = vrot.slane %v959_v8, 7 }
 0x1f9   : > { %v969_v13 = vadd.f32 %v967_v9, %v954_v4 }
 0x1fa   : > { %v968_v39 = vadd.f32 %v966_v11, %v953_v5  ;;  %v972_v63 = vsel %vm648_vm1, %v970_v12, %v971_v37  ;;  %v973_v16 = vsel %vm648_vm1, %v971_v37, %v970_v12 }
 0x1fb   : > { %v974_v17 = vsel %vm640_vm0, %v973_v16, 0.0  ;;  %v982_v50 = vmul.f32 %v1309_v1, %v972_v63  ;;  %v986_v57 = vrot.slane %v972_v63, 7 }
 0x1fc   : > { %v981_v61 = vmul.f32 %v1309_v1, %v974_v17  ;;  %v985_v18 = vrot.slane %v974_v17, 7 }
 0x1fd   : > { %v984_v20 = vadd.f32 %v982_v50, %v969_v13 }
 0x1fe   : > { %v983_v21 = vadd.f32 %v981_v61, %v968_v39  ;;  %v987_v22 = vsel %vm648_vm1, %v985_v18, %v986_v57  ;;  %v988_v23 = vsel %vm648_vm1, %v986_v57, %v985_v18 }
 0x1ff   : > { %v989_v24 = vsel %vm640_vm0, %v988_v23, 0.0  ;;  %v997_v0 = vmul.f32 %v1310_v19, %v987_v22  ;;  %v1001_v25 = vrot.slane %v987_v22, 7 }
 0x200   : > { %v996_v26 = vmul.f32 %v1310_v19, %v989_v24  ;;  %v1000_v27 = vrot.slane %v989_v24, 7 }
 0x201   : > { %v999_v29 = vadd.f32 %v997_v0, %v984_v20 }
 0x202   : > { %v998_v30 = vadd.f32 %v996_v26, %v983_v21  ;;  %v1002_v31 = vsel %vm648_vm1, %v1000_v27, %v1001_v25  ;;  %v1003_v32 = vsel %vm648_vm1, %v1001_v25, %v1000_v27 }
 0x203   : > { %v1004_v33 = vsel %vm640_vm0, %v1003_v32, 0.0  ;;  %v1012_v34 = vmul.f32 %v1311_v28, %v1002_v31  ;;  %v1016_v35 = vrot.slane %v1002_v31, 7 }
 0x204   : > { %v1011_v38 = vmul.f32 %v1311_v28, %v1004_v33  ;;  %v1015_v41 = vrot.slane %v1004_v33, 7 }
 0x205   : > { %v1014_v43 = vadd.f32 %v1012_v34, %v999_v29 }
 0x206   : > { %v1013_v44 = vadd.f32 %v1011_v38, %v998_v30  ;;  %v1017_v45 = vsel %vm648_vm1, %v1015_v41, %v1016_v35  ;;  %v1018_v46 = vsel %vm648_vm1, %v1016_v35, %v1015_v41 }
 0x207   : > { %v1019_v48 = vsel %vm640_vm0, %v1018_v46, 0.0  ;;  %v1027_v49 = vmul.f32 %v1312_v42, %v1017_v45 }
 0x208   : > { %v1026_v51 = vmul.f32 %v1312_v42, %v1019_v48 }
 0x209   : > { %v1029_v52 = vadd.f32 %v1027_v49, %v1014_v43 }
 0x20a   : > { %v1028_v54 = vadd.f32 %v1026_v51, %v1013_v44 }
 0x20b   : > { %v1040_v56 = vadd.f32 %v1038_v53, %v1029_v52 }
 0x20c   : > { %v1039_v58 = vadd.f32 %v1037_v55, %v1028_v54 }
 0x20d   : > { %v1042_v59 = vmul.f32 %v1040_v56, %v2284_v10 }
 0x20e   : > { %v1041_v60 = vmul.f32 %v1039_v58, %v2287_v14 }
 0x210   : > { %1425 = vmatprep.mubr.f32.mxu0 %v1041_v60 }
 0x211   : > { %1426 = vmatmul.mubr.f32.vlgmr.msra.gmra.mrb[4].mxu0 %v1042_v59 }
 0x2e4   : > { %v1427_v15 = vpop.f32.mrb[4].mxu0 }
 0x2e5   : > { %v1138_v10 = vadd.f32 %v1427_v15, %v1314_v36  ;;  %v1132_v40 = vpop.f32.mrb[5].mxu0 }
 0x2e6   : > { %v1133_v14 = vadd.f32 %v1314_v36, %v1132_v40 }
 0x2e7   : > { %1142 = vst [vmem:[%s417_s17 + $0x8] sm:$0xff] %v1138_v10 }
 0x2e8   : > { %1141 = vst [vmem:[%s417_s17] sm:$0xff] %v1133_v14 }
 0x2e9   : > { %1811 = shalt.err (!%p1808_p7)
}
 0x2ea   : > { %s1812_s17 = scalar_lea.hbm %s2453_s28, 256  ;;  %s1816_s21 = scalar_lea.hbm %s2530_s29, 1024 }
 0x2eb   : > { %p1813_p5 = scmp.ne.s32.totalorder %s2453_s28, %s1812_s17  ;;  %p1817_p0 = scmp.lt.u32.totalorder %s2453_s28, %s2530_s29 }
 0x2ec   : > { %p1818_p4 = scmp.lt.u32.totalorder %s1816_s21, %s1812_s17  ;;  %p1820_p6 = scmp.lt.u32.totalorder %s1812_s17, %s2453_s28 }
 0x2ed   : > { %p1814_p10 = pnand %p1813_p5, %p2531_p9 }
 0x2ee   : > { %p1819_p8 = por %p1818_p4, %p1817_p0 }
 0x2ef   : > { %p1815_p11 = pneg %p1814_p10 }
 0x2f0   : > { %p1821_p12 = por %p1820_p6, %p1819_p8 }
 0x2f2   : > { %p1822_p13 = pnand %p1821_p12, %p1815_p11 }
 0x2f4   : > { %1825 = shalt.err (!%p1822_p13)
}
 0x2f5   : > { %s1890_s14 = smov 128   ;;  %s1891_s16 = smov 8  }
 0x2f6   : > { %1546 = dma.vmem_to_hbm [thread:$0]  (%p2531_p9), %s2448_s24, 256, %s2453_s28, %s1144_s25, %s1890_s14, %s1890_s14, %s1891_s16  }
 0x2f7 PF: > { %p1583_p1 = scmp.ge.s32.totalorder %s1876_s12, 2  ;;  %s1172_s13 = sand.u32 1, %s1864_s30  }
 0x2f8   : > { %p2532_p3 = scmp.ne.s32.totalorder %s2519_s26, 0  ;;  %s1173_s17 = scalar_lea.sflag [#allocation4], %s1172_s13 }
 0x2fa   : > { %p1569_p2 = pnand %p1583_p1, %p2532_p3 }
 0x2fc   : > { %1859 = dma.done.wait (!%p1569_p2), %s1173_s17, 256  }
 0x2fd   : > { %1861 = vsyncadd (!%p1569_p2), %s1173_s17, 4294967040  ;;  %p25_p7 = scmp.ge.s32.totalorder %s2103_s9, 6   ;;  %s2533_s30 = smov %s1868_s10 }
 0x2fe   : > { %s2534_s10 = smov %s1872_s11  ;;  %s2535_s11 = smov %s2115_s19 }
 0x2ff   : > { %s2536_s12 = smov %s2103_s9  ;;  %27 = sbr.rel (!%p25_p7) target bundleno = 10 (0xa), region = 123 }
 0x306   :  { %1178 = vsyncpa [#allocation3], 1 }
 0x307   :  { %1180 = vsyncpa [#allocation3 + $0x1], 1 }
 0x308   :  { %1181 = vsyncpa [#allocation6], 1 }
 0x309   :  { %1182 = vsyncpa [#allocation9], 1 }
 0x30a   :  { %1183 = vsyncpa [#allocation12], 1 }
 0x30b   :  { %1184 = vsyncpa [#allocation4], 1 }
 0x30c   :  { %1186 = vsyncpa [#allocation4 + $0x1], 1 }

</bundles_post_ra>
